<compile_context>
chip_gen: v7x
topology: tpu7x:2x2x1
jax: 0.10.0
libtpu: 0.0.40
codegen_flags: <defaults>
</compile_context>

<pallas_src>
import numpy as np
import jax
import jax.numpy as jnp
from jax.experimental import pallas as pl
from jax.experimental.pallas import tpu as pltpu


MXU_DTYPE = jnp.float32   # set to jnp.bfloat16 on v6e/v7x for large batches (acc stays f32)
MAX_TM = 256              # batch tile for large batches (multiple of 8 sublanes)


def _round_up(n, m):
    return ((n + m - 1) // m) * m


# ----------------------------------------------------------------------------
# Fused kernel: chain of (matmul + bias [+ tanh]) stages, everything in VMEM.
# ----------------------------------------------------------------------------
def make_fused_kernel(n_stages, tanh_after):
    def kernel(*refs):
        x_ref = refs[0]
        o_ref = refs[-1]
        h = x_ref[...].astype(jnp.float32)
        for s in range(n_stages):
            w = refs[1 + 2 * s][...]
            b = refs[2 + 2 * s][...].astype(jnp.float32)
            h = jnp.dot(h.astype(MXU_DTYPE), w.astype(MXU_DTYPE),
                        preferred_element_type=jnp.float32) + b
            if tanh_after[s]:
                h = jnp.tanh(h)          # EUP, f32 (v5e has no bf16 EUP)
        o_ref[...] = h.astype(o_ref.dtype)
    return kernel


# ----------------------------------------------------------------------------
# Offline parameter preparation (host numpy, runs once).
# ----------------------------------------------------------------------------
def conv_to_matrix(w_oihw, b, stride, in_chw):
    """Unroll a VALID Conv2d into its exact (Cin*H*W, Cout*Hout*Wout) matrix.

    Output columns use the NCHW flatten order (c*Hout*Wout + ho*Wout + wo), i.e.
    exactly what PyTorch's `x.view(n, -1)` produces, so downstream Linear weights
    need no permutation.
    """
    cin, h, w = in_chw
    cout, cin2, kh, kw = w_oihw.shape
    assert cin == cin2, "conv in_channels mismatch"
    hout = (h - kh) // stride + 1
    wout = (w - kw) // stride + 1
    mat = np.zeros((cin * h * w, cout * hout * wout), np.float32)
    wn = np.asarray(w_oihw, np.float32)
    for co in range(cout):
        for ho in range(hout):
            for wo in range(wout):
                m = (co * hout + ho) * wout + wo
                for ci in range(cin):
                    for ky in range(kh):
                        for kx in range(kw):
                            n = (ci * h + (ho * stride + ky)) * w + (wo * stride + kx)
                            mat[n, m] = wn[co, ci, ky, kx]
    bias_vec = np.repeat(np.asarray(b, np.float32), hout * wout)   # NCHW (c-major)
    return mat, bias_vec, (cout, hout, wout)


def prepare_convmdp_params(in_size, conv_params, lin_ws, lin_bs):
    """conv_params: list of (w_oihw, b, stride); lin_ws/lin_bs in PyTorch (out, in) layout.

    Builds the stage list [(W (Din,Dout), b (1,Dout), tanh_after)], with intermediate
    feature dims zero-padded to lane multiples (exact semantics preserved), and moves
    everything to device once.
    """
    raw = []
    if conv_params:
        # PyTorch forward: w = sqrt(x.size(1)); x = x.view(n, cin, w, w)
        w_sp = int(round(np.sqrt(in_size)))
        chw = (conv_params[0][0].shape[1], w_sp, w_sp)
        for (cw, cb, stride) in conv_params:
            mat, bvec, chw = conv_to_matrix(np.asarray(cw), np.asarray(cb), stride, chw)
            raw.append((mat, bvec, True))                          # tanh after each conv
    n_lin = len(lin_ws)
    for i, (w, b) in enumerate(zip(lin_ws, lin_bs)):
        wt = np.ascontiguousarray(np.asarray(w, np.float32).T)     # (Din, Dout)
        bb = np.asarray(b, np.float32)
        raw.append((wt, bb, i != n_lin - 1))                       # tanh between linears only

    # Lane-pad intermediate dims to multiples of 128 (zeros; exact, padded acts are 0
    # and matching next-stage rows are 0).  Kernel input dim and final output dim are
    # left untouched.
    stages = []
    prev_out_pad = in_size
    n_stages = len(raw)
    for s, (W, b, act) in enumerate(raw):
        din, dout = W.shape
        din_pad = prev_out_pad
        dout_pad = dout if s == n_stages - 1 else _round_up(dout, 128)
        Wp = np.zeros((din_pad, dout_pad), np.float32)
        Wp[:din, :dout] = W
        bp = np.zeros((1, dout_pad), np.float32)
        bp[0, :dout] = b
        stages.append((jnp.asarray(Wp), jnp.asarray(bp), act))
        prev_out_pad = dout_pad

    return {"in_size": in_size, "stages": stages}


# ----------------------------------------------------------------------------
# Forward: one pallas_call, weights resident, batch tiled (and padded) when large.
# ----------------------------------------------------------------------------
def convmdp_forward(x, prep):
    in_size = prep["in_size"]
    stages = prep["stages"]
    x = x.reshape(-1, in_size).astype(jnp.float32)         # x.view(-1, inSize)
    batch = x.shape[0]
    d_out = stages[-1][0].shape[1]

    # TODO(synk): batchNorm / init_batchNorm / finalActivation branches not implemented
    # (this configuration disables all of them).

    if batch <= MAX_TM:
        tm = batch
        padded_batch = batch
        xp = x
    else:
        tm = MAX_TM
        padded_batch = _round_up(batch, tm)
        xp = x if padded_batch == batch else jnp.pad(x, ((0, padded_batch - batch), (0, 0)))
    grid = (padded_batch // tm,)

    in_specs = [pl.BlockSpec((tm, in_size), lambda i: (i, 0))]
    operands = [xp]
    for (w, b, _) in stages:
        din, dout = w.shape
        in_specs.append(pl.BlockSpec((din, dout), lambda i: (0, 0)))   # constant -> resident
        in_specs.append(pl.BlockSpec((1, dout), lambda i: (0, 0)))
        operands += [w, b]

    kernel = make_fused_kernel(len(stages), tuple(t for (_, _, t) in stages))
    out = pl.pallas_call(
        kernel,
        grid=grid,
        in_specs=in_specs,
        out_specs=pl.BlockSpec((tm, d_out), lambda i: (i, 0)),
        out_shape=jax.ShapeDtypeStruct((padded_batch, d_out), jnp.float32),
        compiler_params=pltpu.CompilerParams(
            dimension_semantics=("parallel",),
            vmem_limit_bytes=64 << 20),
    )(*operands)
    return out if padded_batch == batch else out[:batch]


# ----------------------------------------------------------------------------
# Pure-JAX reference (same math, no Pallas, original PyTorch-layout params).
# ----------------------------------------------------------------------------
def convmdp_reference(x, raw_params, in_size):
    x = x.reshape(-1, in_size).astype(jnp.float32)
    b_sz = x.shape[0]
    if raw_params["convs"]:
        w_sp = int(round(np.sqrt(in_size)))
        h = x.reshape(b_sz, raw_params["convs"][0][0].shape[1], w_sp, w_sp)
        for (cw, cb, stride) in raw_params["convs"]:
            h = jax.lax.conv_general_dilated(
                h, cw, window_strides=(stride, stride), padding="VALID",
                dimension_numbers=("NCHW", "OIHW", "NCHW"))
            h = jnp.tanh(h + cb.reshape(1, -1, 1, 1))
        h = h.reshape(b_sz, -1)                            # NCHW flatten, like x.view(n, -1)
    else:
        h = x
    lin_ws, lin_bs = raw_params["lin_w"], raw_params["lin_b"]
    h = h @ lin_ws[0].T + lin_bs[0]
    for i in range(1, len(lin_ws)):
        h = jnp.tanh(h)
        h = h @ lin_ws[i].T + lin_bs[i]
    return h


# ----------------------------------------------------------------------------
if __name__ == "__main__":
    IN_SIZE = 256            # 16x16, single channel
    OUT_SIZE = 8
    LAYERS = [32]
    CONVS = [(1, 4, 3, 1)]   # (in_ch, out_ch, kernel, stride) -> (B,4,14,14) -> 784 features
    BATCH = 2

    key = jax.random.PRNGKey(0)
    kx, k1, k2, k3, k4, k5, k6 = jax.random.split(key, 7)

    conv_w = 0.1 * jax.random.normal(k1, (4, 1, 3, 3), jnp.float32)      # OIHW
    conv_b = 0.1 * jax.random.normal(k2, (4,), jnp.float32)
    feat_after_conv = 4 * 14 * 14                                        # 784
    lin1_w = 0.02 * jax.random.normal(k3, (LAYERS[0], feat_after_conv), jnp.float32)
    lin1_b = 0.02 * jax.random.normal(k4, (LAYERS[0],), jnp.float32)
    lin2_w = 0.02 * jax.random.normal(k5, (OUT_SIZE, LAYERS[0]), jnp.float32)
    lin2_b = 0.02 * jax.random.normal(k6, (OUT_SIZE,), jnp.float32)

    raw_params = {
        "convs": [(conv_w, conv_b, CONVS[0][3])],
        "lin_w": [lin1_w, lin2_w],
        "lin_b": [lin1_b, lin2_b],
    }
    prep = prepare_convmdp_params(
        IN_SIZE,
        [(np.asarray(conv_w), np.asarray(conv_b), CONVS[0][3])],
        [np.asarray(lin1_w), np.asarray(lin2_w)],
        [np.asarray(lin1_b), np.asarray(lin2_b)],
    )

    # Example input, PyTorch-style NCHW image batch
    x = jax.random.normal(kx, (BATCH, 1, 16, 16), jnp.float32)

    out = jax.block_until_ready(convmdp_forward(x, prep))
    assert out.shape == (BATCH, OUT_SIZE)

    ref = jax.block_until_ready(convmdp_reference(x, raw_params, IN_SIZE))
    np.testing.assert_allclose(np.asarray(out), np.asarray(ref), rtol=1e-3, atol=1e-3)

    print("KERNEL_OK")
</pallas_src>

<mosaic_0001>
module attributes {stable_mosaic.version = 11 : i64} {
  func.func @kernel(%arg0: i32, %arg1: memref<2x256xf32, #tpu.memory_space<vmem>>, %arg2: memref<256x896xf32, #tpu.memory_space<vmem>>, %arg3: memref<1x896xf32, #tpu.memory_space<vmem>>, %arg4: memref<896x128xf32, #tpu.memory_space<vmem>>, %arg5: memref<1x128xf32, #tpu.memory_space<vmem>>, %arg6: memref<128x8xf32, #tpu.memory_space<vmem>>, %arg7: memref<1x8xf32, #tpu.memory_space<vmem>>, %arg8: memref<2x8xf32, #tpu.memory_space<vmem>>) attributes {dimension_semantics = [#tpu.dimension_semantics<parallel>], iteration_bounds = array<i64: 1>, scalar_prefetch = 0 : i64, scratch_operands = 0 : i64, tpu.core_type = #tpu.core_type<tc>, window_params = [{transform_indices = @transform_0, window_bounds = array<i64: 2, 256>}, {pipeline_mode = #tpu.pipeline_mode<synchronous>, transform_indices = @transform_1, window_bounds = array<i64: 256, 896>}, {pipeline_mode = #tpu.pipeline_mode<synchronous>, transform_indices = @transform_2, window_bounds = array<i64: 1, 896>}, {pipeline_mode = #tpu.pipeline_mode<synchronous>, transform_indices = @transform_3, window_bounds = array<i64: 896, 128>}, {pipeline_mode = #tpu.pipeline_mode<synchronous>, transform_indices = @transform_4, window_bounds = array<i64: 1, 128>}, {pipeline_mode = #tpu.pipeline_mode<synchronous>, transform_indices = @transform_5, window_bounds = array<i64: 128, 8>}, {pipeline_mode = #tpu.pipeline_mode<synchronous>, transform_indices = @transform_6, window_bounds = array<i64: 1, 8>}, {transform_indices = @transform_7, window_bounds = array<i64: 2, 8>}]} {
    %c0 = arith.constant 0 : index
    %c0_0 = arith.constant 0 : index
    %0 = vector.load %arg1[%c0, %c0_0] : memref<2x256xf32, #tpu.memory_space<vmem>>, vector<2x256xf32>
    %c0_1 = arith.constant 0 : index
    %c0_2 = arith.constant 0 : index
    %1 = vector.load %arg2[%c0_1, %c0_2] : memref<256x896xf32, #tpu.memory_space<vmem>>, vector<256x896xf32>
    %c0_3 = arith.constant 0 : index
    %c0_4 = arith.constant 0 : index
    %2 = vector.load %arg3[%c0_3, %c0_4] : memref<1x896xf32, #tpu.memory_space<vmem>>, vector<1x896xf32>
    %cst = arith.constant dense<0.000000e+00> : vector<2x896xf32>
    %3 = tpu.matmul %0, %1, %cst {dimension_numbers = #tpu.dot_dimension_numbers<[1], [0], [0], [1], [0, 0, 1, 1], [], []>} : vector<2x256xf32>, vector<256x896xf32>, vector<2x896xf32> -> vector<2x896xf32>
    %4 = vector.broadcast %2 : vector<1x896xf32> to vector<2x896xf32>
    %5 = arith.addf %3, %4 : vector<2x896xf32>
    %6 = math.tanh %5 : vector<2x896xf32>
    %c0_5 = arith.constant 0 : index
    %c0_6 = arith.constant 0 : index
    %7 = vector.load %arg4[%c0_5, %c0_6] : memref<896x128xf32, #tpu.memory_space<vmem>>, vector<896x128xf32>
    %c0_7 = arith.constant 0 : index
    %c0_8 = arith.constant 0 : index
    %8 = vector.load %arg5[%c0_7, %c0_8] : memref<1x128xf32, #tpu.memory_space<vmem>>, vector<1x128xf32>
    %cst_9 = arith.constant dense<0.000000e+00> : vector<2x128xf32>
    %9 = tpu.matmul %6, %7, %cst_9 {dimension_numbers = #tpu.dot_dimension_numbers<[1], [0], [0], [1], [0, 0, 1, 1], [], []>} : vector<2x896xf32>, vector<896x128xf32>, vector<2x128xf32> -> vector<2x128xf32>
    %10 = vector.broadcast %8 : vector<1x128xf32> to vector<2x128xf32>
    %11 = arith.addf %9, %10 : vector<2x128xf32>
    %12 = math.tanh %11 : vector<2x128xf32>
    %c0_10 = arith.constant 0 : index
    %c0_11 = arith.constant 0 : index
    %13 = vector.load %arg6[%c0_10, %c0_11] : memref<128x8xf32, #tpu.memory_space<vmem>>, vector<128x8xf32>
    %c0_12 = arith.constant 0 : index
    %c0_13 = arith.constant 0 : index
    %14 = vector.load %arg7[%c0_12, %c0_13] : memref<1x8xf32, #tpu.memory_space<vmem>>, vector<1x8xf32>
    %cst_14 = arith.constant dense<0.000000e+00> : vector<2x8xf32>
    %15 = tpu.matmul %12, %13, %cst_14 {dimension_numbers = #tpu.dot_dimension_numbers<[1], [0], [0], [1], [0, 0, 1, 1], [], []>} : vector<2x128xf32>, vector<128x8xf32>, vector<2x8xf32> -> vector<2x8xf32>
    %16 = vector.broadcast %14 : vector<1x8xf32> to vector<2x8xf32>
    %17 = arith.addf %15, %16 : vector<2x8xf32>
    %c0_15 = arith.constant 0 : index
    %c0_16 = arith.constant 0 : index
    %18 = vector.load %arg8[%c0_15, %c0_16] : memref<2x8xf32, #tpu.memory_space<vmem>>, vector<2x8xf32>
    tpu.vector_store %arg8[%c0_15, %c0_16], %17 {strides = array<i32>} : memref<2x8xf32, #tpu.memory_space<vmem>>, vector<2x8xf32>,
    return
  }
  func.func @transform_0(%arg0: i32) -> (i32, i32) {
    %c0_i32 = arith.constant 0 : i32
    %c0_i32_0 = arith.constant 0 : i32
    return %arg0, %c0_i32 : i32, i32
  }
  func.func @transform_1(%arg0: i32) -> (i32, i32) {
    %c0_i32 = arith.constant 0 : i32
    %c0_i32_0 = arith.constant 0 : i32
    %c0_i32_1 = arith.constant 0 : i32
    return %c0_i32, %c0_i32_0 : i32, i32
  }
  func.func @transform_2(%arg0: i32) -> (i32, i32) {
    %c0_i32 = arith.constant 0 : i32
    %c0_i32_0 = arith.constant 0 : i32
    %c0_i32_1 = arith.constant 0 : i32
    return %c0_i32, %c0_i32_0 : i32, i32
  }
  func.func @transform_3(%arg0: i32) -> (i32, i32) {
    %c0_i32 = arith.constant 0 : i32
    %c0_i32_0 = arith.constant 0 : i32
    %c0_i32_1 = arith.constant 0 : i32
    return %c0_i32, %c0_i32_0 : i32, i32
  }
  func.func @transform_4(%arg0: i32) -> (i32, i32) {
    %c0_i32 = arith.constant 0 : i32
    %c0_i32_0 = arith.constant 0 : i32
    %c0_i32_1 = arith.constant 0 : i32
    return %c0_i32, %c0_i32_0 : i32, i32
  }
  func.func @transform_5(%arg0: i32) -> (i32, i32) {
    %c0_i32 = arith.constant 0 : i32
    %c0_i32_0 = arith.constant 0 : i32
    %c0_i32_1 = arith.constant 0 : i32
    return %c0_i32, %c0_i32_0 : i32, i32
  }
  func.func @transform_6(%arg0: i32) -> (i32, i32) {
    %c0_i32 = arith.constant 0 : i32
    %c0_i32_0 = arith.constant 0 : i32
    %c0_i32_1 = arith.constant 0 : i32
    return %c0_i32, %c0_i32_0 : i32, i32
  }
  func.func @transform_7(%arg0: i32) -> (i32, i32) {
    %c0_i32 = arith.constant 0 : i32
    %c0_i32_0 = arith.constant 0 : i32
    return %arg0, %c0_i32 : i32, i32
  }
}

</mosaic_0001>

<bundles_post_ra>
// kernel: tpu_custom_call.1
= control target key start
LH: loop header
LB: loop body
LE: loop exit
PB: predicated region body
PF: predicated region fallthrough
CT: control target
= control target key end

     0   :  { %12 = vsyncpa [#allocation3], 0  ;;  %s2225_s0 = inlined_call_operand.hbm [shape: f32[2,256], index: 0, kind: input, shape index: {}]   ;;  %s2226_s1 = inlined_call_operand.hbm [shape: f32[256,896], index: 1, kind: input, shape index: {}]   ;;  %s2227_s2 = inlined_call_operand.hbm [shape: f32[1,896], index: 2, kind: input, shape index: {}]   ;;  %s2228_s3 = inlined_call_operand.hbm [shape: f32[896,128], index: 3, kind: input, shape index: {}]   ;;  %s2229_s4 = inlined_call_operand.hbm [shape: f32[1,128], index: 4, kind: input, shape index: {}]   ;;  %s2230_s5 = inlined_call_operand.hbm [shape: f32[128,8], index: 5, kind: input, shape index: {}]   ;;  %s2231_s6 = inlined_call_operand.hbm [shape: f32[1,8], index: 6, kind: input, shape index: {}]   ;;  %s2232_s7 = inlined_call_operand.hbm [shape: f32[2,8], index: 7, kind: output, shape index: {}]  }
   0x1   :  { %13 = vsyncpa [#allocation6], 0 }
   0x2   :  { %14 = vsyncpa [#allocation9], 0 }
   0x3   :  { %15 = vsyncpa [#allocation12], 0 }
   0x4   :  { %16 = vsyncpa [#allocation4], 0  ;;  %s2022_s24 = smov [#allocation5]   ;;  %s1836_s28 = scalar_lea.hbm %s2226_s1, 28672 }
   0x5   :  { %s32_s25 = sshll.u32 %s2022_s24, 4  ;;  %p1837_p0 = scmp.ne.s32.totalorder %s2226_s1, %s1836_s28  ;;  %s33_s25 = int_to_ptr.vmem [resolvable:$true] %s32_s25 }
   0x6   :  { %p1840_p1 = scmp.lt.u32.totalorder %s1836_s28, %s2226_s1 }
   0x8   :  { %p1842_p2 = pnand %p1840_p1, %p1837_p0 }
   0xa   :  { %1845 = shalt.err (!%p1842_p2)
}
   0xb   :  { %s1846_s10 = scalar_lea.vmem %s33_s25, 28672  ;;  %p1851_p4 = scmp.lt.s32.totalorder %s33_s25, %s33_s25 }
   0xc   :  { %p1847_p3 = scmp.ne.s32.totalorder %s33_s25, %s1846_s10  ;;  %p1852_p5 = scmp.lt.s32.totalorder %s1846_s10, %s1846_s10 }
   0xe   :  { %p1853_p6 = por %p1852_p5, %p1851_p4 }
  0x10   :  { %p1854_p7 = pnand %p1853_p6, %p1847_p3 }
  0x12   :  { %1857 = shalt.err (!%p1854_p7)
}
  0x13   :  { %s2023_s11 = smov 896   ;;  %s2024_s12 = smov 56  }
  0x14   :  { %38 = dma.hbm_to_vmem [thread:$0]  %s2226_s1, 28672, %s33_s25, [#allocation6], %s2023_s11, %s2023_s11, %s2024_s12  }
  0x15   :  { %s2025_s15 = smov [#allocation8]   ;;  %s1858_s19 = scalar_lea.hbm %s2228_s3, 14336 }
  0x16   :  { %s54_s16 = sshll.u32 %s2025_s15, 4  ;;  %p1859_p8 = scmp.ne.s32.totalorder %s2228_s3, %s1858_s19  ;;  %s55_s16 = int_to_ptr.vmem [resolvable:$true] %s54_s16 }
  0x17   :  { %p1862_p9 = scmp.lt.u32.totalorder %s1858_s19, %s2228_s3 }
  0x19   :  { %p1864_p10 = pnand %p1862_p9, %p1859_p8 }
  0x1b   :  { %1867 = shalt.err (!%p1864_p10)
}
  0x1c   :  { %s1868_s24 = scalar_lea.vmem %s55_s16, 14336  ;;  %p1873_p12 = scmp.lt.s32.totalorder %s55_s16, %s55_s16 }
  0x1d   :  { %p1869_p11 = scmp.ne.s32.totalorder %s55_s16, %s1868_s24  ;;  %p1874_p13 = scmp.lt.s32.totalorder %s1868_s24, %s1868_s24 }
  0x1f   :  { %p1875_p0 = por %p1874_p13, %p1873_p12 }
  0x21   :  { %p1876_p1 = pnand %p1875_p0, %p1869_p11 }
  0x23   :  { %1879 = shalt.err (!%p1876_p1)
}
  0x24   :  { %s2026_s1 = smov 128   ;;  %s2027_s25 = smov 8  }
  0x25   :  { %60 = dma.hbm_to_vmem [thread:$0]  %s2228_s3, 14336, %s55_s16, [#allocation9], %s2026_s1, %s2026_s1, %s2027_s25  }
  0x26   :  { %s2028_s28 = smov [#allocation11]   ;;  %s2029_s30 = smov [#allocation2]  }
  0x27   :  { %s76_s29 = sshll.u32 %s2028_s28, 4  ;;  %s23_s8 = sshll.u32 %s2029_s30, 4  ;;  %s77_s29 = int_to_ptr.vmem [resolvable:$true] %s76_s29  ;;  %s24_s8 = int_to_ptr.vmem [resolvable:$true] %s23_s8 }
  0x28   :  { %s1880_s11 = scalar_lea.hbm %s2230_s5, 2048 }
  0x29   :  { %p1881_p2 = scmp.ne.s32.totalorder %s2230_s5, %s1880_s11  ;;  %p1884_p3 = scmp.lt.u32.totalorder %s1880_s11, %s2230_s5 }
  0x2b   :  { %p1886_p4 = pnand %p1884_p3, %p1881_p2 }
  0x2d   :  { %1889 = shalt.err (!%p1886_p4)
}
  0x2e   :  { %s1890_s3 = scalar_lea.vmem %s77_s29, 2048  ;;  %p1895_p6 = scmp.lt.s32.totalorder %s77_s29, %s77_s29 }
  0x2f   :  { %p1891_p5 = scmp.ne.s32.totalorder %s77_s29, %s1890_s3  ;;  %p1896_p7 = scmp.lt.s32.totalorder %s1890_s3, %s1890_s3 }
  0x31   :  { %p1897_p8 = por %p1896_p7, %p1895_p6 }
  0x33   :  { %p1898_p9 = pnand %p1897_p8, %p1891_p5 }
  0x35   :  { %1901 = shalt.err (!%p1898_p9)
}
  0x36   :  { %82 = dma.hbm_to_vmem [thread:$0]  %s2230_s5, 2048, %s77_s29, [#allocation12], %s2026_s1, %s2026_s1, %s2027_s25  }
  0x37   :  { %s1902_s20 = scalar_lea.hbm %s2225_s0, 64 }
  0x38   :  { %p1903_p10 = scmp.ne.s32.totalorder %s2225_s0, %s1902_s20  ;;  %p1906_p11 = scmp.lt.u32.totalorder %s1902_s20, %s2225_s0 }
  0x3a   :  { %p1908_p12 = pnand %p1906_p11, %p1903_p10 }
  0x3c   :  { %1911 = shalt.err (!%p1908_p12)
}
  0x3d   :  { %s1912_s26 = scalar_lea.vmem %s24_s8, 64  ;;  %p1917_p0 = scmp.lt.s32.totalorder %s24_s8, %s24_s8 }
  0x3e   :  { %p1913_p13 = scmp.ne.s32.totalorder %s24_s8, %s1912_s26  ;;  %p1918_p1 = scmp.lt.s32.totalorder %s1912_s26, %s1912_s26 }
  0x40   :  { %p1919_p2 = por %p1918_p1, %p1917_p0 }
  0x42   :  { %p1920_p3 = pnand %p1919_p2, %p1913_p13 }
  0x44   :  { %1923 = shalt.err (!%p1920_p3)
}
  0x45   :  { %26 = dma.hbm_to_vmem [thread:$0]  %s2225_s0, 64, %s24_s8, [#allocation3]  }
  0x46   :  { %s2030_s25 = smov [#allocation7]   ;;  %s2031_s28 = smov [#allocation10]  }
  0x47   :  { %s45_s27 = sshll.u32 %s2030_s25, 4  ;;  %s67_s29 = sshll.u32 %s2031_s28, 4  ;;  %s46_s27 = int_to_ptr.vmem [resolvable:$true] %s45_s27  ;;  %s68_s29 = int_to_ptr.vmem [resolvable:$true] %s67_s29 }
  0x48   :  { %s1924_s10 = scalar_lea.hbm %s2227_s2, 112 }
  0x49   :  { %p1925_p4 = scmp.ne.s32.totalorder %s2227_s2, %s1924_s10  ;;  %p1928_p5 = scmp.lt.u32.totalorder %s1924_s10, %s2227_s2 }
  0x4b   :  { %p1930_p6 = pnand %p1928_p5, %p1925_p4 }
  0x4d   :  { %1933 = shalt.err (!%p1930_p6)
}
  0x4e   :  { %s1934_s0 = scalar_lea.vmem %s46_s27, 112  ;;  %s1938_s8 = scalar_lea.vmem %s46_s27, 128 }
  0x4f   :  { %p1935_p7 = scmp.ne.s32.totalorder %s46_s27, %s1934_s0  ;;  %p1939_p8 = scmp.lt.s32.totalorder %s46_s27, %s46_s27 }
  0x50   :  { %p1940_p9 = scmp.lt.s32.totalorder %s1938_s8, %s1934_s0 }
  0x52   :  { %p1941_p10 = por %p1940_p9, %p1939_p8 }
  0x54   :  { %p1942_p11 = pnand %p1941_p10, %p1935_p7 }
  0x56   :  { %1945 = shalt.err (!%p1942_p11)
}
  0x57   :  { %48 = dma.hbm_to_vmem [thread:$0]  %s2227_s2, 112, %s46_s27, [#allocation6]  }
  0x58   :  { %s1946_s18 = scalar_lea.hbm %s2229_s4, 16 }
  0x59   :  { %p1947_p12 = scmp.ne.s32.totalorder %s2229_s4, %s1946_s18  ;;  %p1950_p13 = scmp.lt.u32.totalorder %s1946_s18, %s2229_s4 }
  0x5b   :  { %p1952_p0 = pnand %p1950_p13, %p1947_p12 }
  0x5d   :  { %1955 = shalt.err (!%p1952_p0)
}
  0x5e   :  { %s1956_s23 = scalar_lea.vmem %s68_s29, 16  ;;  %s1960_s24 = scalar_lea.vmem %s68_s29, 32 }
  0x5f   :  { %p1957_p1 = scmp.ne.s32.totalorder %s68_s29, %s1956_s23  ;;  %p1961_p2 = scmp.lt.s32.totalorder %s68_s29, %s68_s29 }
  0x60   :  { %p1962_p3 = scmp.lt.s32.totalorder %s1960_s24, %s1956_s23 }
  0x62   :  { %p1963_p4 = por %p1962_p3, %p1961_p2 }
  0x64   :  { %p1964_p5 = pnand %p1963_p4, %p1957_p1 }
  0x66   :  { %1967 = shalt.err (!%p1964_p5)
}
  0x67   :  { %70 = dma.hbm_to_vmem [thread:$0]  %s2229_s4, 16, %s68_s29, [#allocation9]  }
  0x68   :  { %s2032_s5 = smov [#allocation13]   ;;  %s1968_s28 = scalar_lea.hbm %s2231_s6, 16 }
  0x69   :  { %s89_s1 = sshll.u32 %s2032_s5, 4  ;;  %p1969_p6 = scmp.ne.s32.totalorder %s2231_s6, %s1968_s28  ;;  %s90_s1 = int_to_ptr.vmem [resolvable:$true] %s89_s1 }
  0x6a   :  { %p1972_p7 = scmp.lt.u32.totalorder %s1968_s28, %s2231_s6 }
  0x6c   :  { %p1974_p8 = pnand %p1972_p7, %p1969_p6 }
  0x6e   :  { %1977 = shalt.err (!%p1974_p8)
}
  0x6f   :  { %s1978_s12 = scalar_lea.vmem %s90_s1, 16  ;;  %s1982_s4 = scalar_lea.vmem %s90_s1, 32 }
  0x70   :  { %p1979_p9 = scmp.ne.s32.totalorder %s90_s1, %s1978_s12  ;;  %p1983_p10 = scmp.lt.s32.totalorder %s90_s1, %s90_s1 }
  0x71   :  { %p1984_p11 = scmp.lt.s32.totalorder %s1982_s4, %s1978_s12 }
  0x73   :  { %p1985_p12 = por %p1984_p11, %p1983_p10 }
  0x75   :  { %p1986_p13 = pnand %p1985_p12, %p1979_p9 }
  0x77   :  { %1989 = shalt.err (!%p1986_p13)
}
  0x78   :  { %92 = dma.hbm_to_vmem [thread:$0]  %s2231_s6, 16, %s90_s1, [#allocation12]  }
  0x79   :  { %2012 = dma.done.wait [#allocation3], 64  }
  0x7a   :  { %2013 = vsyncadd [#allocation3], 4294967232 }
  0x7b   :  { %2014 = dma.done.wait [#allocation6], 28784  }
  0x7c   :  { %2015 = vsyncadd [#allocation6], 4294938512 }
  0x7d   :  { %2016 = dma.done.wait [#allocation9], 14352  }
  0x7e   :  { %2017 = vsyncadd [#allocation9], 4294952944 }
  0x7f   :  { %2018 = dma.done.wait [#allocation12], 2064  }
  0x80   :  { %2019 = vsyncadd [#allocation12], 4294965232  ;;  %v116_v0 = vld [vmem:[#allocation5 + $0x8] sm:$0xff]  ;;  %v123_v1 = vld [vmem:[#allocation5 + $0x40] sm:$0xff]  ;;  %vm2034_vm0 = vmmov 0   ;;  %s2036_s6 = smov [#allocation14]  }
  0x81   :  { %v115_v2 = vld [vmem:[#allocation5] sm:$0xff]  ;;  %v1437_v3 = vpack.c.bf16 %v123_v1, %v116_v0  ;;  %v122_v4 = vld [vmem:[#allocation5 + $0x38] sm:$0xff]  ;;  %v125_v6 = vld [vmem:[#allocation5 + $0x50] sm:$0xff]  ;;  %s1178_s14 = sshll.u32 %s2036_s6, 4  ;;  %vm1170_vm1 = vcmask 58368   ;;  %s1179_s14 = int_to_ptr.vmem [resolvable:$true] %s1178_s14 }
  0x82   :  { %v118_v5 = vld [vmem:[#allocation5 + $0x18] sm:$0xff]  ;;  %v1439_v7 = vpack.c.bf16 %v122_v4, %v115_v2  ;;  %v117_v9 = vld [vmem:[#allocation5 + $0x10] sm:$0xff]  ;;  %v124_v10 = vld [vmem:[#allocation5 + $0x48] sm:$0xff]  ;;  %s1990_s0 = scalar_lea.vmem %s1179_s14, 32  ;;  %p1995_p1 = scmp.lt.s32.totalorder %s1179_s14, %s1179_s14 }
  0x83   :  { %v1501_v8 = vpack.c.bf16 %v125_v6, %v118_v5  ;;  %v130_v11 = vld [vmem:[#allocation5 + $0x78] sm:$0xff]  ;;  %1438 = vmatprep.subr.bf16.mxu0 %v1437_v3  ;;  %v1503_v12 = vpack.c.bf16 %v124_v10, %v117_v9  ;;  %v137_v13 = vld [vmem:[#allocation5 + $0xb0] sm:$0xff]  ;;  %v136_v15 = vld [vmem:[#allocation5 + $0xa8] sm:$0xff]  ;;  %p1991_p0 = scmp.ne.s32.totalorder %s1179_s14, %s1990_s0  ;;  %p1996_p2 = scmp.lt.s32.totalorder %s1990_s0, %s1990_s0 }
  0x84   :  { %v129_v14 = vld [vmem:[#allocation5 + $0x70] sm:$0xff]  ;;  %1440 = vmatpush1.bf16.msra.mxu0 %v1439_v7  ;;  %v1441_v16 = vpack.c.bf16 %v137_v13, %v130_v11  ;;  %v132_v18 = vld [vmem:[#allocation5 + $0x88] sm:$0xff]  ;;  %v139_v19 = vld [vmem:[#allocation5 + $0xc0] sm:$0xff] }
  0x85   :  { %1502 = vmatprep.subr.bf16.mxu1 %v1501_v8  ;;  %v1443_v17 = vpack.c.bf16 %v136_v15, %v129_v14  ;;  %v131_v20 = vld [vmem:[#allocation5 + $0x80] sm:$0xff]  ;;  %v1505_v21 = vpack.c.bf16 %v139_v19, %v132_v18  ;;  %v138_v22 = vld [vmem:[#allocation5 + $0xb8] sm:$0xff]  ;;  %v144_v23 = vld [vmem:[#allocation5 + $0xe8] sm:$0xff]  ;;  %p1997_p3 = por %p1996_p2, %p1995_p1 }
  0x86   :  { %1504 = vmatpush1.bf16.msra.mxu1 %v1503_v12  ;;  %v151_v24 = vld [vmem:[#allocation5 + $0x120] sm:$0xff]  ;;  %1442 = vmatprep.subr.bf16.mxu0 %v1441_v16  ;;  %v1507_v25 = vpack.c.bf16 %v138_v22, %v131_v20  ;;  %v150_v28 = vld [vmem:[#allocation5 + $0x118] sm:$0xff]  ;;  %v153_v30 = vld [vmem:[#allocation5 + $0x130] sm:$0xff] }
  0x87   :  { %v1445_v26 = vpack.c.bf16 %v151_v24, %v144_v23  ;;  %v143_v27 = vld [vmem:[#allocation5 + $0xe0] sm:$0xff]  ;;  %v146_v29 = vld [vmem:[#allocation5 + $0xf8] sm:$0xff]  ;;  %1506 = vmatprep.subr.bf16.mxu1 %v1505_v21  ;;  %v145_v31 = vld [vmem:[#allocation5 + $0xf0] sm:$0xff]  ;;  %p1998_p4 = pnand %p1997_p3, %p1991_p0 }
  0x88   :  { %v152_v32 = vld [vmem:[#allocation5 + $0x128] sm:$0xff]  ;;  %1444 = vmatpush1.bf16.msra.mxu0 %v1443_v17  ;;  %v1447_v33 = vpack.c.bf16 %v150_v28, %v143_v27  ;;  %v1509_v34 = vpack.c.bf16 %v153_v30, %v146_v29  ;;  %v158_v35 = vld [vmem:[#allocation5 + $0x158] sm:$0xff]  ;;  %v165_v36 = vld [vmem:[#allocation5 + $0x190] sm:$0xff] }
  0x89   :  { %v157_v37 = vld [vmem:[#allocation5 + $0x150] sm:$0xff]  ;;  %1446 = vmatprep.subr.bf16.mxu0 %v1445_v26  ;;  %v1511_v38 = vpack.c.bf16 %v152_v32, %v145_v31  ;;  %v1449_v39 = vpack.c.bf16 %v165_v36, %v158_v35  ;;  %v164_v40 = vld [vmem:[#allocation5 + $0x188] sm:$0xff]  ;;  %v167_v42 = vld [vmem:[#allocation5 + $0x1a0] sm:$0xff] }
  0x8a   :  { %1508 = vmatpush1.bf16.msra.mxu1 %v1507_v25  ;;  %v160_v41 = vld [vmem:[#allocation5 + $0x168] sm:$0xff]  ;;  %v159_v44 = vld [vmem:[#allocation5 + $0x160] sm:$0xff]  ;;  %v166_v45 = vld [vmem:[#allocation5 + $0x198] sm:$0xff]  ;;  %v1451_v48 = vpack.c.bf16 %v164_v40, %v157_v37 }
  0x8b   :  { %1510 = vmatprep.subr.bf16.mxu1 %v1509_v34  ;;  %v1513_v43 = vpack.c.bf16 %v167_v42, %v160_v41  ;;  %v172_v46 = vld [vmem:[#allocation5 + $0x1c8] sm:$0xff]  ;;  %v179_v47 = vld [vmem:[#allocation5 + $0x200] sm:$0xff]  ;;  %v174_v49 = vld [vmem:[#allocation5 + $0x1d8] sm:$0xff]  ;;  %v1515_v51 = vpack.c.bf16 %v166_v45, %v159_v44 }
  0x8c   :  { %1448 = vmatpush1.bf16.msra.mxu0 %v1447_v33  ;;  %v181_v50 = vld [vmem:[#allocation5 + $0x210] sm:$0xff]  ;;  %v1453_v52 = vpack.c.bf16 %v179_v47, %v172_v46  ;;  %v171_v53 = vld [vmem:[#allocation5 + $0x1c0] sm:$0xff]  ;;  %v178_v54 = vld [vmem:[#allocation5 + $0x1f8] sm:$0xff] }
  0x8d   :  { %1450 = vmatprep.subr.bf16.mxu0 %v1449_v39  ;;  %v173_v55 = vld [vmem:[#allocation5 + $0x1d0] sm:$0xff]  ;;  %v1517_v56 = vpack.c.bf16 %v181_v50, %v174_v49  ;;  %v180_v57 = vld [vmem:[#allocation5 + $0x208] sm:$0xff]  ;;  %v186_v58 = vld [vmem:[#allocation5 + $0x238] sm:$0xff]  ;;  %v1455_v62 = vpack.c.bf16 %v178_v54, %v171_v53 }
  0x8e   :  { %1512 = vmatpush1.bf16.msra.mxu1 %v1511_v38  ;;  %v193_v59 = vld [vmem:[#allocation5 + $0x270] sm:$0xff]  ;;  %v188_v60 = vld [vmem:[#allocation5 + $0x248] sm:$0xff]  ;;  %v195_v61 = vld [vmem:[#allocation5 + $0x280] sm:$0xff]  ;;  %v1519_v63 = vpack.c.bf16 %v180_v57, %v173_v55 }
  0x8f   :  { %1514 = vmatprep.subr.bf16.mxu1 %v1513_v43  ;;  %v1457_v0 = vpack.c.bf16 %v193_v59, %v186_v58  ;;  %v185_v1 = vld [vmem:[#allocation5 + $0x230] sm:$0xff]  ;;  %v192_v2 = vld [vmem:[#allocation5 + $0x268] sm:$0xff]  ;;  %v187_v3 = vld [vmem:[#allocation5 + $0x240] sm:$0xff]  ;;  %v1521_v4 = vpack.c.bf16 %v195_v61, %v188_v60 }
  0x90   :  { %1452 = vmatpush1.bf16.msra.mxu0 %v1451_v48  ;;  %v194_v5 = vld [vmem:[#allocation5 + $0x278] sm:$0xff]  ;;  %v200_v6 = vld [vmem:[#allocation5 + $0x2a8] sm:$0xff]  ;;  %v207_v7 = vld [vmem:[#allocation5 + $0x2e0] sm:$0xff]  ;;  %v1459_v10 = vpack.c.bf16 %v192_v2, %v185_v1 }
  0x91   :  { %1454 = vmatprep.subr.bf16.mxu0 %v1453_v52  ;;  %v202_v8 = vld [vmem:[#allocation5 + $0x2b8] sm:$0xff]  ;;  %v209_v9 = vld [vmem:[#allocation5 + $0x2f0] sm:$0xff]  ;;  %v1523_v11 = vpack.c.bf16 %v194_v5, %v187_v3  ;;  %v1461_v12 = vpack.c.bf16 %v207_v7, %v200_v6  ;;  %v199_v13 = vld [vmem:[#allocation5 + $0x2a0] sm:$0xff] }
  0x92   :  { %1516 = vmatpush1.bf16.msra.mxu1 %v1515_v51  ;;  %v206_v14 = vld [vmem:[#allocation5 + $0x2d8] sm:$0xff]  ;;  %v201_v15 = vld [vmem:[#allocation5 + $0x2b0] sm:$0xff]  ;;  %v1525_v16 = vpack.c.bf16 %v209_v9, %v202_v8  ;;  %v208_v17 = vld [vmem:[#allocation5 + $0x2e8] sm:$0xff] }
  0x93   :  { %1518 = vmatprep.subr.bf16.mxu1 %v1517_v56  ;;  %v214_v18 = vld [vmem:[#allocation5 + $0x318] sm:$0xff]  ;;  %v221_v19 = vld [vmem:[#allocation5 + $0x350] sm:$0xff]  ;;  %v216_v20 = vld [vmem:[#allocation5 + $0x328] sm:$0xff]  ;;  %v1463_v22 = vpack.c.bf16 %v206_v14, %v199_v13  ;;  %v1527_v23 = vpack.c.bf16 %v208_v17, %v201_v15 }
  0x94   :  { %1456 = vmatpush1.bf16.msra.mxu0 %v1455_v62  ;;  %v223_v21 = vld [vmem:[#allocation5 + $0x360] sm:$0xff]  ;;  %v1465_v24 = vpack.c.bf16 %v221_v19, %v214_v18  ;;  %v213_v25 = vld [vmem:[#allocation5 + $0x310] sm:$0xff]  ;;  %v220_v26 = vld [vmem:[#allocation5 + $0x348] sm:$0xff] }
  0x95   :  { %1458 = vmatprep.subr.bf16.mxu0 %v1457_v0  ;;  %v215_v27 = vld [vmem:[#allocation5 + $0x320] sm:$0xff]  ;;  %v1529_v28 = vpack.c.bf16 %v223_v21, %v216_v20  ;;  %v222_v29 = vld [vmem:[#allocation5 + $0x358] sm:$0xff]  ;;  %v228_v30 = vld [vmem:[#allocation5 + $0x388] sm:$0xff]  ;;  %v1467_v34 = vpack.c.bf16 %v220_v26, %v213_v25 }
  0x96   :  { %1520 = vmatpush1.bf16.msra.mxu1 %v1519_v63  ;;  %v235_v31 = vld [vmem:[#allocation5 + $0x3c0] sm:$0xff]  ;;  %v230_v32 = vld [vmem:[#allocation5 + $0x398] sm:$0xff]  ;;  %v237_v33 = vld [vmem:[#allocation5 + $0x3d0] sm:$0xff]  ;;  %v1531_v35 = vpack.c.bf16 %v222_v29, %v215_v27 }
  0x97   :  { %1522 = vmatprep.subr.bf16.mxu1 %v1521_v4  ;;  %v1469_v36 = vpack.c.bf16 %v235_v31, %v228_v30  ;;  %v227_v37 = vld [vmem:[#allocation5 + $0x380] sm:$0xff]  ;;  %v234_v38 = vld [vmem:[#allocation5 + $0x3b8] sm:$0xff]  ;;  %v229_v39 = vld [vmem:[#allocation5 + $0x390] sm:$0xff]  ;;  %v1533_v40 = vpack.c.bf16 %v237_v33, %v230_v32 }
  0x98   :  { %1460 = vmatpush1.bf16.msra.mxu0 %v1459_v10  ;;  %v236_v41 = vld [vmem:[#allocation5 + $0x3c8] sm:$0xff]  ;;  %v242_v42 = vld [vmem:[#allocation5 + $0x3f8] sm:$0xff]  ;;  %v249_v43 = vld [vmem:[#allocation5 + $0x430] sm:$0xff]  ;;  %v1471_v46 = vpack.c.bf16 %v234_v38, %v227_v37 }
  0x99   :  { %1462 = vmatprep.subr.bf16.mxu0 %v1461_v12  ;;  %v244_v44 = vld [vmem:[#allocation5 + $0x408] sm:$0xff]  ;;  %v251_v45 = vld [vmem:[#allocation5 + $0x440] sm:$0xff]  ;;  %v1535_v47 = vpack.c.bf16 %v236_v41, %v229_v39  ;;  %v1473_v48 = vpack.c.bf16 %v249_v43, %v242_v42  ;;  %v241_v49 = vld [vmem:[#allocation5 + $0x3f0] sm:$0xff] }
  0x9a   :  { %1524 = vmatpush1.bf16.msra.mxu1 %v1523_v11  ;;  %v248_v50 = vld [vmem:[#allocation5 + $0x428] sm:$0xff]  ;;  %v243_v51 = vld [vmem:[#allocation5 + $0x400] sm:$0xff]  ;;  %v1537_v52 = vpack.c.bf16 %v251_v45, %v244_v44  ;;  %v250_v53 = vld [vmem:[#allocation5 + $0x438] sm:$0xff] }
  0x9b   :  { %1526 = vmatprep.subr.bf16.mxu1 %v1525_v16  ;;  %v256_v54 = vld [vmem:[#allocation5 + $0x468] sm:$0xff]  ;;  %v263_v55 = vld [vmem:[#allocation5 + $0x4a0] sm:$0xff]  ;;  %v258_v56 = vld [vmem:[#allocation5 + $0x478] sm:$0xff]  ;;  %v1475_v58 = vpack.c.bf16 %v248_v50, %v241_v49  ;;  %v1539_v59 = vpack.c.bf16 %v250_v53, %v243_v51 }
  0x9c   :  { %1464 = vmatpush1.bf16.msra.mxu0 %v1463_v22  ;;  %v265_v57 = vld [vmem:[#allocation5 + $0x4b0] sm:$0xff]  ;;  %v1477_v60 = vpack.c.bf16 %v263_v55, %v256_v54  ;;  %v255_v61 = vld [vmem:[#allocation5 + $0x460] sm:$0xff]  ;;  %v262_v62 = vld [vmem:[#allocation5 + $0x498] sm:$0xff] }
  0x9d   :  { %1466 = vmatprep.subr.bf16.mxu0 %v1465_v24  ;;  %v257_v63 = vld [vmem:[#allocation5 + $0x470] sm:$0xff]  ;;  %v1541_v0 = vpack.c.bf16 %v265_v57, %v258_v56  ;;  %v264_v1 = vld [vmem:[#allocation5 + $0x4a8] sm:$0xff]  ;;  %v270_v2 = vld [vmem:[#allocation5 + $0x4d8] sm:$0xff]  ;;  %v1479_v6 = vpack.c.bf16 %v262_v62, %v255_v61 }
  0x9e   :  { %1528 = vmatpush1.bf16.msra.mxu1 %v1527_v23  ;;  %v277_v3 = vld [vmem:[#allocation5 + $0x510] sm:$0xff]  ;;  %v272_v4 = vld [vmem:[#allocation5 + $0x4e8] sm:$0xff]  ;;  %v279_v5 = vld [vmem:[#allocation5 + $0x520] sm:$0xff]  ;;  %v1543_v8 = vpack.c.bf16 %v264_v1, %v257_v63 }
  0x9f   :  { %1530 = vmatprep.subr.bf16.mxu1 %v1529_v28  ;;  %v269_v7 = vld [vmem:[#allocation5 + $0x4d0] sm:$0xff]  ;;  %v1481_v9 = vpack.c.bf16 %v277_v3, %v270_v2  ;;  %v276_v10 = vld [vmem:[#allocation5 + $0x508] sm:$0xff]  ;;  %v271_v11 = vld [vmem:[#allocation5 + $0x4e0] sm:$0xff]  ;;  %v1545_v13 = vpack.c.bf16 %v279_v5, %v272_v4 }
  0xa0   :  { %1468 = vmatpush1.bf16.msra.mxu0 %v1467_v34  ;;  %v278_v12 = vld [vmem:[#allocation5 + $0x518] sm:$0xff]  ;;  %v284_v14 = vld [vmem:[#allocation5 + $0x548] sm:$0xff]  ;;  %v291_v15 = vld [vmem:[#allocation5 + $0x580] sm:$0xff]  ;;  %v1483_v20 = vpack.c.bf16 %v276_v10, %v269_v7 }
  0xa1   :  { %1470 = vmatprep.subr.bf16.mxu0 %v1469_v36  ;;  %v2161_v16 = vld.sshfl [vmem:[#allocation2] sm:$0x33 pattern:$0x76325410]  ;;  %v293_v18 = vld [vmem:[#allocation5 + $0x590] sm:$0xff]  ;;  %v1547_v21 = vpack.c.bf16 %v278_v12, %v271_v11  ;;  %v1485_v22 = vpack.c.bf16 %v291_v15, %v284_v14  ;;  %v283_v23 = vld [vmem:[#allocation5 + $0x540] sm:$0xff] }
  0xa2   :  { %1532 = vmatpush1.bf16.msra.mxu1 %v1531_v35  ;;  %v286_v17 = vld [vmem:[#allocation5 + $0x558] sm:$0xff]  ;;  %v2165_v19 = vcombine.high %v2161_v16, %v2161_v16  ;;  %v285_v25 = vld [vmem:[#allocation5 + $0x550] sm:$0xff]  ;;  %v292_v27 = vld [vmem:[#allocation5 + $0x588] sm:$0xff] }
  0xa3   :  { %1534 = vmatprep.subr.bf16.mxu1 %v1533_v40  ;;  %v290_v24 = vld [vmem:[#allocation5 + $0x578] sm:$0xff]  ;;  %v1549_v26 = vpack.c.bf16 %v293_v18, %v286_v17  ;;  %v305_v29 = vld [vmem:[#allocation5 + $0x5f0] sm:$0xff]  ;;  %v300_v30 = vld [vmem:[#allocation5 + $0x5c8] sm:$0xff]  ;;  %v1551_v33 = vpack.c.bf16 %v292_v27, %v285_v25 }
  0xa4   :  { %1472 = vmatpush1.bf16.msra.mxu0 %v1471_v46  ;;  %v298_v28 = vld [vmem:[#allocation5 + $0x5b8] sm:$0xff]  ;;  %451 = vmatprep.mubr.f32.mxu0 %v2165_v19  ;;  %v307_v31 = vld [vmem:[#allocation5 + $0x600] sm:$0xff]  ;;  %v1487_v32 = vpack.c.bf16 %v290_v24, %v283_v23  ;;  %v297_v35 = vld [vmem:[#allocation5 + $0x5b0] sm:$0xff] }
  0xa5   :  { %1474 = vmatprep.subr.bf16.mxu0 %v1473_v48  ;;  %522 = vmatprep.mubr.f32.mxu1 %v2165_v19  ;;  %v1489_v34 = vpack.c.bf16 %v305_v29, %v298_v28  ;;  %v304_v36 = vld [vmem:[#allocation5 + $0x5e8] sm:$0xff]  ;;  %v299_v37 = vld [vmem:[#allocation5 + $0x5c0] sm:$0xff]  ;;  %v1553_v38 = vpack.c.bf16 %v307_v31, %v300_v30  ;;  %v306_v39 = vld [vmem:[#allocation5 + $0x5f8] sm:$0xff] }
  0xa6   :  { %1536 = vmatpush1.bf16.msra.mxu1 %v1535_v47  ;;  %v312_v40 = vld [vmem:[#allocation5 + $0x628] sm:$0xff]  ;;  %v319_v41 = vld [vmem:[#allocation5 + $0x660] sm:$0xff]  ;;  %v314_v42 = vld [vmem:[#allocation5 + $0x638] sm:$0xff]  ;;  %v1491_v44 = vpack.c.bf16 %v304_v36, %v297_v35  ;;  %v1555_v45 = vpack.c.bf16 %v306_v39, %v299_v37 }
  0xa7   :  { %1538 = vmatprep.subr.bf16.mxu1 %v1537_v52  ;;  %v321_v43 = vld [vmem:[#allocation5 + $0x670] sm:$0xff]  ;;  %v1493_v46 = vpack.c.bf16 %v319_v41, %v312_v40  ;;  %v311_v47 = vld [vmem:[#allocation5 + $0x620] sm:$0xff]  ;;  %v318_v48 = vld [vmem:[#allocation5 + $0x658] sm:$0xff] }
  0xa8   :  { %1476 = vmatpush1.bf16.msra.mxu0 %v1475_v58  ;;  %v313_v49 = vld [vmem:[#allocation5 + $0x630] sm:$0xff]  ;;  %v1557_v50 = vpack.c.bf16 %v321_v43, %v314_v42  ;;  %v320_v51 = vld [vmem:[#allocation5 + $0x668] sm:$0xff]  ;;  %v326_v52 = vld [vmem:[#allocation5 + $0x698] sm:$0xff]  ;;  %v1495_v56 = vpack.c.bf16 %v318_v48, %v311_v47 }
  0xa9   :  { %1478 = vmatprep.subr.bf16.mxu0 %v1477_v60  ;;  %v333_v53 = vld [vmem:[#allocation5 + $0x6d0] sm:$0xff]  ;;  %v328_v54 = vld [vmem:[#allocation5 + $0x6a8] sm:$0xff]  ;;  %v335_v55 = vld [vmem:[#allocation5 + $0x6e0] sm:$0xff]  ;;  %v1559_v57 = vpack.c.bf16 %v320_v51, %v313_v49 }
  0xaa   :  { %1540 = vmatpush1.bf16.msra.mxu1 %v1539_v59  ;;  %v1497_v58 = vpack.c.bf16 %v333_v53, %v326_v52  ;;  %v325_v59 = vld [vmem:[#allocation5 + $0x690] sm:$0xff]  ;;  %v332_v60 = vld [vmem:[#allocation5 + $0x6c8] sm:$0xff]  ;;  %v327_v61 = vld [vmem:[#allocation5 + $0x6a0] sm:$0xff]  ;;  %v1561_v62 = vpack.c.bf16 %v335_v55, %v328_v54 }
  0xab   :  { %1542 = vmatprep.subr.bf16.mxu1 %v1541_v0  ;;  %v334_v63 = vld [vmem:[#allocation5 + $0x6d8] sm:$0xff]  ;;  %v120_v0 = vld [vmem:[#allocation5 + $0x28] sm:$0xff]  ;;  %v127_v1 = vld [vmem:[#allocation5 + $0x60] sm:$0xff]  ;;  %v1499_v4 = vpack.c.bf16 %v332_v60, %v325_v59 }
  0xac   :  { %1480 = vmatpush1.bf16.msra.mxu0 %v1479_v6  ;;  %v233_v2 = vld [vmem:[#allocation5 + $0x3b0] sm:$0xff]  ;;  %v240_v3 = vld [vmem:[#allocation5 + $0x3e8] sm:$0xff]  ;;  %v1563_v5 = vpack.c.bf16 %v334_v63, %v327_v61  ;;  %v1565_v6 = vpack.c.bf16 %v127_v1, %v120_v0  ;;  %v119_v7 = vld [vmem:[#allocation5 + $0x20] sm:$0xff] }
  0xad   :  { %1482 = vmatprep.subr.bf16.mxu0 %v1481_v9  ;;  %v134_v9 = vld [vmem:[#allocation5 + $0x98] sm:$0xff]  ;;  %v141_v10 = vld [vmem:[#allocation5 + $0xd0] sm:$0xff]  ;;  %v1629_v11 = vpack.c.bf16 %v240_v3, %v233_v2  ;;  %v247_v14 = vld [vmem:[#allocation5 + $0x420] sm:$0xff] }
  0xae   :  { %1544 = vmatpush1.bf16.msra.mxu1 %v1543_v8  ;;  %v126_v8 = vld [vmem:[#allocation5 + $0x58] sm:$0xff]  ;;  %v121_v12 = vld [vmem:[#allocation5 + $0x30] sm:$0xff]  ;;  %v1569_v18 = vpack.c.bf16 %v141_v10, %v134_v9  ;;  %v155_v24 = vld [vmem:[#allocation5 + $0x140] sm:$0xff] }
  0xaf   :  { %1546 = vmatprep.subr.bf16.mxu1 %v1545_v13  ;;  %v128_v13 = vld [vmem:[#allocation5 + $0x68] sm:$0xff]  ;;  %v254_v15 = vld [vmem:[#allocation5 + $0x458] sm:$0xff]  ;;  %v1567_v17 = vpack.c.bf16 %v126_v8, %v119_v7  ;;  %v261_v28 = vld [vmem:[#allocation5 + $0x490] sm:$0xff] }
  0xb0   :  { %1484 = vmatpush1.bf16.msra.mxu0 %v1483_v20  ;;  %v133_v20 = vld [vmem:[#allocation5 + $0x90] sm:$0xff]  ;;  %v1631_v23 = vpack.c.bf16 %v128_v13, %v121_v12  ;;  %v1633_v25 = vpack.c.bf16 %v254_v15, %v247_v14  ;;  %v142_v27 = vld [vmem:[#allocation5 + $0xd8] sm:$0xff]  ;;  %v268_v29 = vld [vmem:[#allocation5 + $0x4c8] sm:$0xff] }
  0xb1   :  { %1486 = vmatprep.subr.bf16.mxu0 %v1485_v22  ;;  %v148_v22 = vld [vmem:[#allocation5 + $0x108] sm:$0xff]  ;;  %v169_v36 = vld [vmem:[#allocation5 + $0x1b0] sm:$0xff]  ;;  %v1637_v37 = vpack.c.bf16 %v268_v29, %v261_v28  ;;  %v275_v40 = vld [vmem:[#allocation5 + $0x500] sm:$0xff] }
  0xb2   :  { %1548 = vmatpush1.bf16.msra.mxu1 %v1547_v21  ;;  %v140_v21 = vld [vmem:[#allocation5 + $0xc8] sm:$0xff]  ;;  %v1573_v31 = vpack.c.bf16 %v155_v24, %v148_v22  ;;  %v282_v41 = vld [vmem:[#allocation5 + $0x538] sm:$0xff]  ;;  %v183_v48 = vld [vmem:[#allocation5 + $0x220] sm:$0xff] }
  0xb3   :  { %1550 = vmatprep.subr.bf16.mxu1 %v1549_v26  ;;  %v135_v26 = vld [vmem:[#allocation5 + $0xa0] sm:$0xff]  ;;  %v1571_v30 = vpack.c.bf16 %v140_v21, %v133_v20  ;;  %v156_v39 = vld [vmem:[#allocation5 + $0x148] sm:$0xff]  ;;  %v1641_v49 = vpack.c.bf16 %v282_v41, %v275_v40  ;;  %v170_v51 = vld [vmem:[#allocation5 + $0x1b8] sm:$0xff] }
  0xb4   :  { %1488 = vmatpush1.bf16.msra.mxu0 %v1487_v32  ;;  %v147_v32 = vld [vmem:[#allocation5 + $0x100] sm:$0xff]  ;;  %v1635_v35 = vpack.c.bf16 %v142_v27, %v135_v26  ;;  %v289_v52 = vld [vmem:[#allocation5 + $0x570] sm:$0xff]  ;;  %v296_v53 = vld [vmem:[#allocation5 + $0x5a8] sm:$0xff] }
  0xb5   :  { %1490 = vmatprep.subr.bf16.mxu0 %v1489_v34  ;;  %v162_v34 = vld [vmem:[#allocation5 + $0x178] sm:$0xff]  ;;  %v175_v55 = vld [vmem:[#allocation5 + $0x1e0] sm:$0xff]  ;;  %v197_v59 = vld [vmem:[#allocation5 + $0x290] sm:$0xff]  ;;  %v1645_v60 = vpack.c.bf16 %v296_v53, %v289_v52 }
  0xb6   :  { %1552 = vmatpush1.bf16.msra.mxu1 %v1551_v33  ;;  %v154_v33 = vld [vmem:[#allocation5 + $0x138] sm:$0xff]  ;;  %v1577_v43 = vpack.c.bf16 %v169_v36, %v162_v34  ;;  %v177_v61 = vld [vmem:[#allocation5 + $0x1f0] sm:$0xff]  ;;  %v303_v63 = vld [vmem:[#allocation5 + $0x5e0] sm:$0xff] }
  0xb7   :  { %1554 = vmatprep.subr.bf16.mxu1 %v1553_v38  ;;  %v149_v38 = vld [vmem:[#allocation5 + $0x110] sm:$0xff]  ;;  %v1575_v42 = vpack.c.bf16 %v154_v33, %v147_v32  ;;  %v310_v0 = vld [vmem:[#allocation5 + $0x618] sm:$0xff]  ;;  %v211_v7 = vld [vmem:[#allocation5 + $0x300] sm:$0xff] }
  0xb8   :  { %1492 = vmatpush1.bf16.msra.mxu0 %v1491_v44  ;;  %v161_v44 = vld [vmem:[#allocation5 + $0x170] sm:$0xff]  ;;  %v1639_v47 = vpack.c.bf16 %v156_v39, %v149_v38  ;;  %v1649_v8 = vpack.c.bf16 %v310_v0, %v303_v63  ;;  %v191_v9 = vld [vmem:[#allocation5 + $0x260] sm:$0xff]  ;;  %v198_v10 = vld [vmem:[#allocation5 + $0x298] sm:$0xff] }
  0xb9   :  { %1494 = vmatprep.subr.bf16.mxu0 %v1493_v46  ;;  %v176_v46 = vld [vmem:[#allocation5 + $0x1e8] sm:$0xff]  ;;  %v189_v3 = vld [vmem:[#allocation5 + $0x250] sm:$0xff]  ;;  %v203_v15 = vld [vmem:[#allocation5 + $0x2c0] sm:$0xff]  ;;  %v1651_v20 = vpack.c.bf16 %v198_v10, %v191_v9 }
  0xba   :  { %1556 = vmatpush1.bf16.msra.mxu1 %v1555_v45  ;;  %v168_v45 = vld [vmem:[#allocation5 + $0x1a8] sm:$0xff]  ;;  %v225_v21 = vld [vmem:[#allocation5 + $0x370] sm:$0xff]  ;;  %v338_v26 = vld [vmem:[#allocation5 + $0x6f8] sm:$0xff] }
  0xbb   :  { %1558 = vmatprep.subr.bf16.mxu1 %v1557_v50  ;;  %v163_v50 = vld [vmem:[#allocation5 + $0x180] sm:$0xff]  ;;  %v1579_v54 = vpack.c.bf16 %v168_v45, %v161_v44  ;;  %v324_v12 = vld [vmem:[#allocation5 + $0x688] sm:$0xff]  ;;  %v217_v29 = vld [vmem:[#allocation5 + $0x330] sm:$0xff] }
  0xbc   :  { %1496 = vmatpush1.bf16.msra.mxu0 %v1495_v56  ;;  %v182_v56 = vld [vmem:[#allocation5 + $0x218] sm:$0xff]  ;;  %v212_v24 = vld [vmem:[#allocation5 + $0x308] sm:$0xff]  ;;  %v239_v33 = vld [vmem:[#allocation5 + $0x3e0] sm:$0xff] }
  0xbd   :  { %1498 = vmatprep.subr.bf16.mxu0 %v1497_v58  ;;  %v1643_v58 = vpack.c.bf16 %v170_v51, %v163_v50  ;;  %v1583_v1 = vpack.c.bf16 %v182_v56, %v175_v55  ;;  %v226_v36 = vld [vmem:[#allocation5 + $0x378] sm:$0xff]  ;;  %v694_v38 = vld [vmem:[#allocation8 + $0x88] sm:$0xff]  ;;  %v231_v41 = vld [vmem:[#allocation5 + $0x3a0] sm:$0xff] }
  0xbe   :  { %1560 = vmatpush1.bf16.msra.mxu1 %v1559_v57  ;;  %v190_v57 = vld [vmem:[#allocation5 + $0x258] sm:$0xff]  ;;  %v253_v45 = vld [vmem:[#allocation5 + $0x450] sm:$0xff]  ;;  %v696_v50 = vld [vmem:[#allocation8 + $0x98] sm:$0xff] }
  0xbf   :  { %1562 = vmatprep.subr.bf16.mxu1 %v1561_v62  ;;  %v184_v62 = vld [vmem:[#allocation5 + $0x228] sm:$0xff]  ;;  %v1585_v2 = vpack.c.bf16 %v197_v59, %v190_v57  ;;  %v245_v53 = vld [vmem:[#allocation5 + $0x410] sm:$0xff]  ;;  %v267_v56 = vld [vmem:[#allocation5 + $0x4c0] sm:$0xff] }
  0xc0   :  { %1500 = vmatpush1.bf16.msra.mxu0 %v1499_v4  ;;  %v196_v4 = vld [vmem:[#allocation5 + $0x288] sm:$0xff]  ;;  %v680_v59 = vld [vmem:[#allocation8 + $0x18] sm:$0xff] }
  0xc1   :  { %1566 = vmatprep.subr.bf16.mxu0 %v1565_v6  ;;  %v1647_v6 = vpack.c.bf16 %v184_v62, %v177_v61  ;;  %v1587_v13 = vpack.c.bf16 %v196_v4, %v189_v3  ;;  %v698_v61 = vld [vmem:[#allocation8 + $0xa8] sm:$0xff]  ;;  %v259_v0 = vld [vmem:[#allocation5 + $0x480] sm:$0xff] }
  0xc2   :  { %1564 = vmatpush1.bf16.msra.mxu1 %v1563_v5  ;;  %v204_v5 = vld [vmem:[#allocation5 + $0x2c8] sm:$0xff]  ;;  %v281_v4 = vld [vmem:[#allocation5 + $0x530] sm:$0xff]  ;;  %v700_v9 = vld [vmem:[#allocation8 + $0xb8] sm:$0xff] }
  0xc3   :  { %1630 = vmatprep.subr.bf16.mxu1 %v1629_v11  ;;  %452 = vmatmul.mubr.f32.vlgmr.msra.gmra.mrb[0].mxu0 %v2161_v16  ;;  %v317_v11 = vld [vmem:[#allocation5 + $0x650] sm:$0xff]  ;;  %v1589_v14 = vpack.c.bf16 %v211_v7, %v204_v5 }
  0xc4   :  { %1568 = vmatpush1.bf16.msra.mxu0 %v1567_v17  ;;  %593 = vmatprep.mubr.f32.mxu0 %v2165_v19  ;;  %v210_v17 = vld [vmem:[#allocation5 + $0x2f8] sm:$0xff]  ;;  %v1653_v22 = vpack.c.bf16 %v324_v12, %v317_v11  ;;  %v682_v7 = vld [vmem:[#allocation8 + $0x28] sm:$0xff] }
  0xc5   :  { %523 = vmatmul.mubr.f32.vlgmr.msra.gmra.mrb[0].mxu1 %v2161_v16  ;;  %1570 = vmatprep.subr.bf16.mxu0 %v1569_v18  ;;  %v218_v18 = vld [vmem:[#allocation5 + $0x338] sm:$0xff]  ;;  %v1591_v27 = vpack.c.bf16 %v210_v17, %v203_v15  ;;  %v273_v12 = vld [vmem:[#allocation5 + $0x4f0] sm:$0xff]  ;;  %v295_v17 = vld [vmem:[#allocation5 + $0x5a0] sm:$0xff] }
  0xc6   :  { %1632 = vmatpush3.bf16.msra.mxu1 %v1631_v23  ;;  %664 = vmatprep.mubr.f32.mxu1 %v2165_v19  ;;  %v1581_v19 = vpack.c.bf16 %v183_v48, %v176_v46  ;;  %v205_v23 = vld [vmem:[#allocation5 + $0x2d0] sm:$0xff]  ;;  %v1593_v28 = vpack.c.bf16 %v225_v21, %v218_v18  ;;  %v684_v21 = vld [vmem:[#allocation8 + $0x38] sm:$0xff] }
  0xc7   :  { %1634 = vmatprep.subr.bf16.mxu1 %v1633_v25  ;;  %v331_v25 = vld [vmem:[#allocation5 + $0x6c0] sm:$0xff]  ;;  %v1655_v32 = vpack.c.bf16 %v212_v24, %v205_v23  ;;  %v678_v48 = vld [vmem:[#allocation8 + $0x8] sm:$0xff] }
  0xc8   :  { %1572 = vmatpush1.bf16.msra.mxu0 %v1571_v30  ;;  %v224_v30 = vld [vmem:[#allocation5 + $0x368] sm:$0xff]  ;;  %v1657_v34 = vpack.c.bf16 %v338_v26, %v331_v25  ;;  %v287_v24 = vld [vmem:[#allocation5 + $0x560] sm:$0xff]  ;;  %v294_v25 = vld [vmem:[#allocation5 + $0x598] sm:$0xff] }
  0xc9   :  { %1574 = vmatprep.subr.bf16.mxu0 %v1573_v31  ;;  %v232_v31 = vld [vmem:[#allocation5 + $0x3a8] sm:$0xff]  ;;  %v1595_v39 = vpack.c.bf16 %v224_v30, %v217_v29  ;;  %v1615_v29 = vpack.c.bf16 %v294_v25, %v287_v24  ;;  %v735_v24 = vld [vmem:[#allocation8 + $0x1d0] sm:$0xff]  ;;  %v736_v25 = vld [vmem:[#allocation8 + $0x1d8] sm:$0xff] }
  0xca   :  { %1636 = vmatpush3.bf16.msra.mxu1 %v1635_v35  ;;  %v219_v35 = vld [vmem:[#allocation5 + $0x340] sm:$0xff]  ;;  %v1597_v40 = vpack.c.bf16 %v239_v33, %v232_v31  ;;  %v301_v31 = vld [vmem:[#allocation5 + $0x5d0] sm:$0xff]  ;;  %v316_v33 = vld [vmem:[#allocation5 + $0x648] sm:$0xff] }
  0xcb   :  { %1638 = vmatprep.subr.bf16.mxu1 %v1637_v37  ;;  %v693_v37 = vld [vmem:[#allocation8 + $0x80] sm:$0xff]  ;;  %v1659_v44 = vpack.c.bf16 %v226_v36, %v219_v35 }
  0xcc   :  { %1576 = vmatpush1.bf16.msra.mxu0 %v1575_v42  ;;  %v238_v42 = vld [vmem:[#allocation5 + $0x3d8] sm:$0xff]  ;;  %v1661_v46 = vpack.c.bf16 %v694_v38, %v693_v37  ;;  %v315_v37 = vld [vmem:[#allocation5 + $0x640] sm:$0xff] }
  0xcd   :  { %1578 = vmatprep.subr.bf16.mxu0 %v1577_v43  ;;  %v246_v43 = vld [vmem:[#allocation5 + $0x418] sm:$0xff]  ;;  %v1599_v51 = vpack.c.bf16 %v238_v42, %v231_v41 }
  0xce   :  { %1640 = vmatpush3.bf16.msra.mxu1 %v1639_v47  ;;  %v677_v47 = vld [vmem:[#allocation8] sm:$0xff]  ;;  %v1601_v52 = vpack.c.bf16 %v253_v45, %v246_v43  ;;  %v322_v38 = vld [vmem:[#allocation5 + $0x678] sm:$0xff]  ;;  %v329_v43 = vld [vmem:[#allocation5 + $0x6b0] sm:$0xff] }
  0xcf   :  { %1642 = vmatprep.subr.bf16.mxu1 %v1641_v49  ;;  %v695_v49 = vld [vmem:[#allocation8 + $0x90] sm:$0xff]  ;;  %v1663_v55 = vpack.c.bf16 %v678_v48, %v677_v47  ;;  %v1623_v41 = vpack.c.bf16 %v322_v38, %v315_v37  ;;  %v725_v45 = vld [vmem:[#allocation8 + $0x180] sm:$0xff]  ;;  %v738_v37 = vld [vmem:[#allocation8 + $0x1e8] sm:$0xff] }
  0xd0   :  { %1580 = vmatpush1.bf16.msra.mxu0 %v1579_v54  ;;  %v252_v54 = vld [vmem:[#allocation5 + $0x448] sm:$0xff]  ;;  %v1665_v57 = vpack.c.bf16 %v696_v50, %v695_v49  ;;  %v710_v50 = vld [vmem:[#allocation8 + $0x108] sm:$0xff] }
  0xd1   :  { %1582 = vmatprep.subr.bf16.mxu0 %v1581_v19  ;;  %v260_v19 = vld [vmem:[#allocation5 + $0x488] sm:$0xff]  ;;  %v1603_v62 = vpack.c.bf16 %v252_v54, %v245_v53 }
  0xd2   :  { %1644 = vmatpush3.bf16.msra.mxu1 %v1643_v58  ;;  %v679_v58 = vld [vmem:[#allocation8 + $0x10] sm:$0xff]  ;;  %v1605_v63 = vpack.c.bf16 %v267_v56, %v260_v19  ;;  %v709_v49 = vld [vmem:[#allocation8 + $0x100] sm:$0xff] }
  0xd3   :  { %1646 = vmatprep.subr.bf16.mxu1 %v1645_v60  ;;  %v697_v60 = vld [vmem:[#allocation8 + $0xa0] sm:$0xff]  ;;  %v1667_v3 = vpack.c.bf16 %v680_v59, %v679_v58  ;;  %v1695_v53 = vpack.c.bf16 %v710_v50, %v709_v49  ;;  %v711_v19 = vld [vmem:[#allocation8 + $0x110] sm:$0xff] }
  0xd4   :  { %1584 = vmatpush1.bf16.msra.mxu0 %v1583_v1  ;;  %v266_v1 = vld [vmem:[#allocation5 + $0x4b8] sm:$0xff]  ;;  %v1669_v5 = vpack.c.bf16 %v698_v61, %v697_v60  ;;  %v729_v56 = vld [vmem:[#allocation8 + $0x1a0] sm:$0xff]  ;;  %v714_v61 = vld [vmem:[#allocation8 + $0x128] sm:$0xff] }
  0xd5   :  { %1586 = vmatprep.subr.bf16.mxu0 %v1585_v2  ;;  %v274_v2 = vld [vmem:[#allocation5 + $0x4f8] sm:$0xff]  ;;  %v1607_v10 = vpack.c.bf16 %v266_v1, %v259_v0  ;;  %v713_v60 = vld [vmem:[#allocation8 + $0x120] sm:$0xff] }
  0xd6   :  { %1648 = vmatpush3.bf16.msra.mxu1 %v1647_v6  ;;  %v681_v6 = vld [vmem:[#allocation8 + $0x20] sm:$0xff]  ;;  %v1609_v11 = vpack.c.bf16 %v281_v4, %v274_v2  ;;  %v1703_v0 = vpack.c.bf16 %v714_v61, %v713_v60  ;;  %v715_v2 = vld [vmem:[#allocation8 + $0x130] sm:$0xff]  ;;  %v2179_v60 = vld [vmem:[#allocation7] sm:$0xff] }
  0xd7   :  { %1650 = vmatprep.subr.bf16.mxu1 %v1649_v8  ;;  %v699_v8 = vld [vmem:[#allocation8 + $0xb0] sm:$0xff]  ;;  %v1671_v15 = vpack.c.bf16 %v682_v7, %v681_v6  ;;  %v685_v7 = vld [vmem:[#allocation8 + $0x40] sm:$0xff] }
  0xd8   :  { %1588 = vmatpush1.bf16.msra.mxu0 %v1587_v13  ;;  %v280_v13 = vld [vmem:[#allocation5 + $0x528] sm:$0xff]  ;;  %v1673_v18 = vpack.c.bf16 %v700_v9, %v699_v8  ;;  %v686_v8 = vld [vmem:[#allocation8 + $0x48] sm:$0xff] }
  0xd9   :  { %1590 = vmatprep.subr.bf16.mxu0 %v1589_v14  ;;  %v288_v14 = vld [vmem:[#allocation5 + $0x568] sm:$0xff]  ;;  %v1679_v9 = vpack.c.bf16 %v686_v8, %v685_v7 }
  0xda   :  { %1652 = vmatpush3.bf16.msra.mxu1 %v1651_v20  ;;  %v683_v20 = vld [vmem:[#allocation8 + $0x30] sm:$0xff]  ;;  %v1613_v23 = vpack.c.bf16 %v295_v17, %v288_v14  ;;  %v718_v14 = vld [vmem:[#allocation8 + $0x148] sm:$0xff]  ;;  %v721_v38 = vld [vmem:[#allocation8 + $0x160] sm:$0xff] }
  0xdb   :  { %1654 = vmatprep.subr.bf16.mxu1 %v1653_v22  ;;  %v1611_v22 = vpack.c.bf16 %v280_v13, %v273_v12  ;;  %v1675_v26 = vpack.c.bf16 %v684_v21, %v683_v20  ;;  %v717_v13 = vld [vmem:[#allocation8 + $0x140] sm:$0xff]  ;;  %v703_v17 = vld [vmem:[#allocation8 + $0xd0] sm:$0xff] }
  0xdc   :  { %1592 = vmatpush1.bf16.msra.mxu0 %v1591_v27  ;;  %v302_v27 = vld [vmem:[#allocation5 + $0x5d8] sm:$0xff] }
  0xdd   :  { %1594 = vmatprep.subr.bf16.mxu0 %v1593_v28  ;;  %v309_v28 = vld [vmem:[#allocation5 + $0x610] sm:$0xff]  ;;  %v687_v21 = vld [vmem:[#allocation8 + $0x50] sm:$0xff] }
  0xde   :  { %1656 = vmatpush3.bf16.msra.mxu1 %v1655_v32  ;;  %v1617_v30 = vpack.c.bf16 %v309_v28, %v302_v27  ;;  %v308_v32 = vld [vmem:[#allocation5 + $0x608] sm:$0xff]  ;;  %v719_v27 = vld [vmem:[#allocation8 + $0x150] sm:$0xff]  ;;  %v720_v28 = vld [vmem:[#allocation8 + $0x158] sm:$0xff] }
  0xdf   :  { %1658 = vmatprep.subr.bf16.mxu1 %v1657_v34  ;;  %v323_v34 = vld [vmem:[#allocation5 + $0x680] sm:$0xff]  ;;  %v1619_v35 = vpack.c.bf16 %v308_v32, %v301_v31  ;;  %v706_v31 = vld [vmem:[#allocation8 + $0xe8] sm:$0xff] }
  0xe0   :  { %1596 = vmatpush1.bf16.msra.mxu0 %v1595_v39  ;;  %v1621_v36 = vpack.c.bf16 %v323_v34, %v316_v33  ;;  %v330_v39 = vld [vmem:[#allocation5 + $0x6b8] sm:$0xff]  ;;  %v689_v33 = vld [vmem:[#allocation8 + $0x60] sm:$0xff]  ;;  %v690_v34 = vld [vmem:[#allocation8 + $0x68] sm:$0xff] }
  0xe1   :  { %1598 = vmatprep.subr.bf16.mxu0 %v1597_v40  ;;  %v337_v40 = vld [vmem:[#allocation5 + $0x6f0] sm:$0xff] }
  0xe2   :  { %1660 = vmatpush3.bf16.msra.mxu1 %v1659_v44  ;;  %v1625_v42 = vpack.c.bf16 %v337_v40, %v330_v39  ;;  %v336_v44 = vld [vmem:[#allocation5 + $0x6e8] sm:$0xff]  ;;  %v722_v39 = vld [vmem:[#allocation8 + $0x168] sm:$0xff] }
  0xe3   :  { %1662 = vmatprep.subr.bf16.mxu1 %v1661_v46  ;;  %v726_v46 = vld [vmem:[#allocation8 + $0x188] sm:$0xff]  ;;  %v1627_v47 = vpack.c.bf16 %v336_v44, %v329_v43  ;;  %v708_v43 = vld [vmem:[#allocation8 + $0xf8] sm:$0xff]  ;;  %v691_v44 = vld [vmem:[#allocation8 + $0x70] sm:$0xff] }
  0xe4   :  { %1600 = vmatpush1.bf16.msra.mxu0 %v1599_v51  ;;  %v1693_v48 = vpack.c.bf16 %v726_v46, %v725_v45  ;;  %v727_v51 = vld [vmem:[#allocation8 + $0x190] sm:$0xff]  ;;  %v692_v46 = vld [vmem:[#allocation8 + $0x78] sm:$0xff] }
  0xe5   :  { %665 = vmatmul.mubr.f32.vlgmr.msra.gmra.mrb[2].mxu1 %v2161_v16  ;;  %1602 = vmatprep.subr.bf16.mxu0 %v1601_v52  ;;  %v728_v52 = vld [vmem:[#allocation8 + $0x198] sm:$0xff]  ;;  %v1691_v49 = vpack.c.bf16 %v692_v46, %v691_v44  ;;  %v747_v44 = vld [vmem:[#allocation8 + $0x230] sm:$0xff] }
  0xe6   :  { %1664 = vmatpush3.bf16.msra.mxu1 %v1663_v55  ;;  %v1697_v54 = vpack.c.bf16 %v728_v52, %v727_v51  ;;  %v712_v55 = vld [vmem:[#allocation8 + $0x118] sm:$0xff]  ;;  %v723_v51 = vld [vmem:[#allocation8 + $0x170] sm:$0xff] }
  0xe7   :  { %1666 = vmatprep.subr.bf16.mxu1 %v1665_v57  ;;  %v730_v57 = vld [vmem:[#allocation8 + $0x1a8] sm:$0xff]  ;;  %v1699_v58 = vpack.c.bf16 %v712_v55, %v711_v19  ;;  %v724_v52 = vld [vmem:[#allocation8 + $0x178] sm:$0xff] }
  0xe8   :  { %1604 = vmatpush1.bf16.msra.mxu0 %v1603_v62  ;;  %v1701_v59 = vpack.c.bf16 %v730_v57, %v729_v56  ;;  %v731_v62 = vld [vmem:[#allocation8 + $0x1b0] sm:$0xff]  ;;  %v758_v19 = vld [vmem:[#allocation8 + $0x288] sm:$0xff]  ;;  %v2033_v56 = vmov 0.0|0.0   ;;  %v341_v57 = vlaneseq }
  0xe9   :  { %1606 = vmatprep.subr.bf16.mxu0 %v1605_v63  ;;  %v732_v63 = vld [vmem:[#allocation8 + $0x1b8] sm:$0xff] }
  0xea   :  { %1668 = vmatpush3.bf16.msra.mxu1 %v1667_v3  ;;  %v1705_v1 = vpack.c.bf16 %v732_v63, %v731_v62  ;;  %v716_v3 = vld [vmem:[#allocation8 + $0x138] sm:$0xff] }
  0xeb   :  { %1670 = vmatprep.subr.bf16.mxu1 %v1669_v5  ;;  %v1707_v4 = vpack.c.bf16 %v716_v3, %v715_v2  ;;  %v701_v5 = vld [vmem:[#allocation8 + $0xc0] sm:$0xff] }
  0xec   :  { %1608 = vmatpush1.bf16.msra.mxu0 %v1607_v10  ;;  %v733_v10 = vld [vmem:[#allocation8 + $0x1c0] sm:$0xff] }
  0xed   :  { %1610 = vmatprep.subr.bf16.mxu0 %v1609_v11  ;;  %v734_v11 = vld [vmem:[#allocation8 + $0x1c8] sm:$0xff] }
  0xee   :  { %1672 = vmatpush3.bf16.msra.mxu1 %v1671_v15  ;;  %v1709_v12 = vpack.c.bf16 %v734_v11, %v733_v10  ;;  %v1711_v15 = vpack.c.bf16 %v718_v14, %v717_v13  ;;  %v741_v11 = vld [vmem:[#allocation8 + $0x200] sm:$0xff]  ;;  %v759_v13 = vld [vmem:[#allocation8 + $0x290] sm:$0xff]  ;;  %v760_v14 = vld [vmem:[#allocation8 + $0x298] sm:$0xff] }
  0xef   :  { %1674 = vmatprep.subr.bf16.mxu1 %v1673_v18  ;;  %v704_v18 = vld [vmem:[#allocation8 + $0xd8] sm:$0xff] }
  0xf0   :  { %1612 = vmatpush1.bf16.msra.mxu0 %v1611_v22  ;;  %v1681_v20 = vpack.c.bf16 %v704_v18, %v703_v17  ;;  %v688_v22 = vld [vmem:[#allocation8 + $0x58] sm:$0xff]  ;;  %v774_v17 = vld [vmem:[#allocation8 + $0x308] sm:$0xff] }
  0xf1   :  { %1614 = vmatprep.subr.bf16.mxu0 %v1613_v23  ;;  %v1683_v23 = vpack.c.bf16 %v688_v22, %v687_v21  ;;  %v1729_v22 = vpack.c.bf16 %v760_v14, %v759_v13  ;;  %v754_v13 = vld [vmem:[#allocation8 + $0x268] sm:$0xff] }
  0xf2   :  { %1676 = vmatpush3.bf16.msra.mxu1 %v1675_v26  ;;  %v1713_v26 = vpack.c.bf16 %v736_v25, %v735_v24  ;;  %v744_v24 = vld [vmem:[#allocation8 + $0x218] sm:$0xff] }
  0xf4   :  { %1616 = vmatpush1.bf16.msra.mxu0 %v1615_v29  ;;  %v1715_v29 = vpack.c.bf16 %v720_v28, %v719_v27  ;;  %v761_v27 = vld [vmem:[#allocation8 + $0x2a0] sm:$0xff]  ;;  %v762_v28 = vld [vmem:[#allocation8 + $0x2a8] sm:$0xff] }
  0xf5   :  { %1618 = vmatprep.subr.bf16.mxu0 %v1617_v30  ;;  %v705_v30 = vld [vmem:[#allocation8 + $0xe0] sm:$0xff] }
  0xf6   :  { %v1685_v32 = vpack.c.bf16 %v706_v31, %v705_v30  ;;  %v775_v30 = vld [vmem:[#allocation8 + $0x310] sm:$0xff]  ;;  %v776_v31 = vld [vmem:[#allocation8 + $0x318] sm:$0xff] }
  0xf8   :  { %1620 = vmatpush1.bf16.msra.mxu0 %v1619_v35  ;;  %v737_v35 = vld [vmem:[#allocation8 + $0x1e0] sm:$0xff] }
  0xf9   :  { %1622 = vmatprep.subr.bf16.mxu0 %v1621_v36  ;;  %v1687_v36 = vpack.c.bf16 %v690_v34, %v689_v33  ;;  %v1717_v40 = vpack.c.bf16 %v738_v37, %v737_v35  ;;  %v1733_v33 = vpack.c.bf16 %v762_v28, %v761_v27  ;;  %v745_v34 = vld [vmem:[#allocation8 + $0x220] sm:$0xff]  ;;  %v746_v35 = vld [vmem:[#allocation8 + $0x228] sm:$0xff]  ;;  %v763_v37 = vld [vmem:[#allocation8 + $0x2b0] sm:$0xff] }
  0xfa   :  { %v787_v28 = vld [vmem:[#allocation8 + $0x370] sm:$0xff] }
  0xfc   :  { %1624 = vmatpush1.bf16.msra.mxu0 %v1623_v41  ;;  %v1719_v41 = vpack.c.bf16 %v722_v39, %v721_v38  ;;  %v764_v38 = vld [vmem:[#allocation8 + $0x2b8] sm:$0xff]  ;;  %v2035_v39 = vmov 0.0  }
  0xfd   :  { %1626 = vmatprep.subr.bf16.mxu0 %v1625_v42  ;;  %v707_v42 = vld [vmem:[#allocation8 + $0xf0] sm:$0xff] }
  0xfe   :  { %v1689_v45 = vpack.c.bf16 %v708_v43, %v707_v42  ;;  %v1735_v42 = vpack.c.bf16 %v746_v35, %v745_v34  ;;  %v1737_v43 = vpack.c.bf16 %v764_v38, %v763_v37 }
 0x100   :  { %1628 = vmatpush1.bf16.msra.mxu0 %v1627_v47  ;;  %v739_v47 = vld [vmem:[#allocation8 + $0x1f0] sm:$0xff] }
 0x101   :  { %1694 = vmatprep.subr.bf16.mxu0 %v1693_v48  ;;  %v740_v48 = vld [vmem:[#allocation8 + $0x1f8] sm:$0xff] }
 0x102   :  { %v1721_v50 = vpack.c.bf16 %v740_v48, %v739_v47  ;;  %v765_v47 = vld [vmem:[#allocation8 + $0x2c0] sm:$0xff]  ;;  %v766_v48 = vld [vmem:[#allocation8 + $0x2c8] sm:$0xff] }
 0x103   :  { %594 = vmatmul.mubr.f32.vlgmr.msra.gmra.mrb[2].mxu0 %v2161_v16  ;;  %v702_v16 = vld [vmem:[#allocation8 + $0xc8] sm:$0xff] }
 0x104   :  { %1696 = vmatpush3.bf16.msra.mxu0 %v1695_v53  ;;  %v1677_v6 = vpack.c.bf16 %v702_v16, %v701_v5  ;;  %v1723_v53 = vpack.c.bf16 %v724_v52, %v723_v51  ;;  %v1741_v52 = vpack.c.bf16 %v766_v48, %v765_v47  ;;  %v1080_v47 = vld [vmem:[#allocation11 + $0x18] sm:$0xff]  ;;  %v1081_v48 = vld [vmem:[#allocation11 + $0x20] sm:$0xff] }
 0x105   :  { %1698 = vmatprep.subr.bf16.mxu0 %v1697_v54  ;;  %v757_v54 = vld [vmem:[#allocation8 + $0x280] sm:$0xff] }
 0x106   :  { %1678 = vmatprep.subr.bf16.mxu1 %v1677_v6  ;;  %v1725_v55 = vpack.c.bf16 %v758_v19, %v757_v54  ;;  %v750_v54 = vld [vmem:[#allocation8 + $0x248] sm:$0xff] }
 0x107   :  { %1680 = vmatpush3.bf16.msra.mxu1 %v1679_v9 }
 0x108   :  { %1700 = vmatpush3.bf16.msra.mxu0 %v1699_v58  ;;  %1682 = vmatprep.subr.bf16.mxu1 %v1681_v20  ;;  %v2176_v58 = vshrl.u32 %v341_v57, 7  ;;  %v768_v57 = vld [vmem:[#allocation8 + $0x2d8] sm:$0xff] }
 0x109   :  { %1702 = vmatprep.subr.bf16.mxu0 %v1701_v59 }
 0x10a   :  { %v343_v59 = vsub.s32 0, %v2176_v58  ;;  %v347_v61 = vsub.s32 1, %v2176_v58  ;;  %v351_v62 = vsub.s32 2, %v2176_v58  ;;  %v355_v63 = vsub.s32 3, %v2176_v58 }
 0x10b   :  { %1684 = vmatpush3.bf16.msra.mxu1 %v1683_v23  ;;  %v743_v23 = vld [vmem:[#allocation8 + $0x210] sm:$0xff]  ;;  %v363_v34 = vsub.s32 5, %v2176_v58 }
 0x10c   :  { %1704 = vmatpush3.bf16.msra.mxu0 %v1703_v0  ;;  %1686 = vmatprep.subr.bf16.mxu1 %v1685_v32  ;;  %v344_v0 = vrot.slane %v2179_v60, %v343_v59  ;;  %v352_v2 = vrot.slane %v2179_v60, %v351_v62  ;;  %v356_v3 = vrot.slane %v2179_v60, %v355_v63  ;;  %v781_v59 = vld [vmem:[#allocation8 + $0x340] sm:$0xff]  ;;  %v367_v63 = vsub.s32 6, %v2176_v58 }
 0x10d   :  { %1706 = vmatprep.subr.bf16.mxu0 %v1705_v1  ;;  %v348_v1 = vrot.slane %v2179_v60, %v347_v61  ;;  %v1731_v32 = vpack.c.bf16 %v744_v24, %v743_v23  ;;  %v782_v61 = vld [vmem:[#allocation8 + $0x348] sm:$0xff] }
 0x10f   :  { %1688 = vmatpush3.bf16.msra.mxu1 %v1687_v36  ;;  %v1761_v36 = vpack.c.bf16 %v776_v31, %v775_v30 }
 0x110   :  { %1708 = vmatpush3.bf16.msra.mxu0 %v1707_v4  ;;  %1690 = vmatprep.subr.bf16.mxu1 %v1689_v45  ;;  %v748_v45 = vld [vmem:[#allocation8 + $0x238] sm:$0xff] }
 0x111   :  { %1710 = vmatprep.subr.bf16.mxu0 %v1709_v12  ;;  %v742_v12 = vld [vmem:[#allocation8 + $0x208] sm:$0xff]  ;;  %v1739_v51 = vpack.c.bf16 %v748_v45, %v747_v44 }
 0x112   :  { %v1727_v20 = vpack.c.bf16 %v742_v12, %v741_v11  ;;  %v753_v12 = vld [vmem:[#allocation8 + $0x260] sm:$0xff]  ;;  %v1078_v45 = vld [vmem:[#allocation11 + $0x8] sm:$0xff] }
 0x113   :  { %1692 = vmatpush3.bf16.msra.mxu1 %v1691_v49  ;;  %v779_v49 = vld [vmem:[#allocation8 + $0x330] sm:$0xff]  ;;  %v1751_v23 = vpack.c.bf16 %v754_v13, %v753_v12  ;;  %v1077_v44 = vld [vmem:[#allocation11] sm:$0xff] }
 0x114   :  { %1712 = vmatpush3.bf16.msra.mxu0 %v1711_v15  ;;  %1726 = vmatprep.subr.bf16.mxu1 %v1725_v55  ;;  %v773_v15 = vld [vmem:[#allocation8 + $0x300] sm:$0xff]  ;;  %v767_v55 = vld [vmem:[#allocation8 + $0x2d0] sm:$0xff] }
 0x115   :  { %1714 = vmatprep.subr.bf16.mxu0 %v1713_v26  ;;  %v1758_v26 = vpack.c.bf16 %v774_v17, %v773_v15  ;;  %v771_v17 = vld [vmem:[#allocation8 + $0x2f0] sm:$0xff] }
 0x118   :  { %1716 = vmatpush3.bf16.msra.mxu0 %v1715_v29 }
 0x119   :  { %1718 = vmatprep.subr.bf16.mxu0 %v1717_v40  ;;  %v777_v40 = vld [vmem:[#allocation8 + $0x320] sm:$0xff] }
 0x11c   :  { %1720 = vmatpush3.bf16.msra.mxu0 %v1719_v41  ;;  %v778_v41 = vld [vmem:[#allocation8 + $0x328] sm:$0xff] }
 0x11d   :  { %1722 = vmatprep.subr.bf16.mxu0 %v1721_v50  ;;  %v1764_v46 = vpack.c.bf16 %v778_v41, %v777_v40  ;;  %v780_v50 = vld [vmem:[#allocation8 + $0x338] sm:$0xff] }
 0x11e   :  { %v1767_v19 = vpack.c.bf16 %v780_v50, %v779_v49  ;;  %v1082_v49 = vld [vmem:[#allocation11 + $0x28] sm:$0xff] }
 0x11f   :  { %v1788_v50 = vpack.c.bf16 %v1082_v49, %v1081_v48 }
 0x120   :  { %1724 = vmatpush3.bf16.msra.mxu0 %v1723_v53  ;;  %v749_v53 = vld [vmem:[#allocation8 + $0x240] sm:$0xff] }
 0x121   :  { %1757 = vmatprep.subr.bf16.mxu0 %v2033_v56  ;;  %v1743_v62 = vpack.c.bf16 %v750_v54, %v749_v53  ;;  %v1085_v53 = vld [vmem:[#allocation11 + $0x40] sm:$0xff]  ;;  %v1086_v54 = vld [vmem:[#allocation11 + $0x48] sm:$0xff] }
 0x196   :  { %v453_v4 = vpop.f32.mrb[0].mxu0 }
 0x197   :  { %v454_v5 = vadd.f32 %v453_v4, %v344_v0  ;;  %v455_v16 = vpop.f32.mrb[1].mxu0  ;;  %v1745_v0 = vpack.c.bf16 %v768_v57, %v767_v55  ;;  %v769_v4 = vld [vmem:[#allocation8 + $0x2e0] sm:$0xff]  ;;  %v1087_v55 = vld [vmem:[#allocation11 + $0x50] sm:$0xff] }
 0x198   :  { %v524_v6 = vpop.f32.mrb[0].mxu1  ;;  %v456_v7 = vadd.f32 %v455_v16, %v348_v1  ;;  %v751_v1 = vld [vmem:[#allocation8 + $0x250] sm:$0xff]  ;;  %v1088_v57 = vld [vmem:[#allocation11 + $0x58] sm:$0xff] }
 0x199   :  { %v525_v8 = vadd.f32 %v524_v6, %v352_v2  ;;  %v526_v9 = vpop.f32.mrb[1].mxu1  ;;  %1820 = vtanh.f32 %v454_v5  ;;  %v752_v2 = vld [vmem:[#allocation8 + $0x258] sm:$0xff]  ;;  %v770_v5 = vld [vmem:[#allocation8 + $0x2e8] sm:$0xff]  ;;  %v783_v16 = vld [vmem:[#allocation8 + $0x350] sm:$0xff] }
 0x19a   :  { %v527_v10 = vadd.f32 %v526_v9, %v356_v3  ;;  %1822 = vtanh.f32 %v456_v7  ;;  %v1770_v3 = vpack.c.bf16 %v782_v61, %v781_v59  ;;  %v784_v6 = vld [vmem:[#allocation8 + $0x358] sm:$0xff]  ;;  %v1747_v9 = vpack.c.bf16 %v752_v2, %v751_v1  ;;  %v1089_v61 = vld [vmem:[#allocation11 + $0x60] sm:$0xff] }
 0x19b   :  { %1824 = vtanh.f32 %v525_v8  ;;  %v368_v8 = vrot.slane %v2179_v60, %v367_v63  ;;  %v1749_v11 = vpack.c.bf16 %v770_v5, %v769_v4  ;;  %v1773_v15 = vpack.c.bf16 %v784_v6, %v783_v16  ;;  %v1092_v1 = vld [vmem:[#allocation11 + $0x78] sm:$0xff] }
 0x19c   :  { %1826 = vtanh.f32 %v527_v10  ;;  %v1797_v59 = vpack.c.bf16 %v1088_v57, %v1087_v55  ;;  %v1191_v4 = vld [vmem:[#allocation10] ss:$0 sm:$0xff] }
 0x1a3   :  { %v1821_v18 = vpop.eup %1820 }
 0x1a4   :  { %v1823_v21 = vpop.eup %1822 }
 0x1a5   :  { %v1825_v25 = vpop.eup %1824  ;;  %860 = vmatprep.mubr.f32.mxu1 %v1823_v21  ;;  %v786_v21 = vld [vmem:[#allocation8 + $0x368] sm:$0xff] }
 0x1a6   :  { %v1827_v29 = vpop.eup %1826  ;;  %861 = vmatmul.mubr.f32.vlgmr.msra.gmra.mrb[4].mxu1 %v1821_v18  ;;  %v772_v18 = vld [vmem:[#allocation8 + $0x2f8] sm:$0xff] }
 0x1a7   :  { %930 = vmatprep.mubr.f32.mxu0 %v1827_v29  ;;  %1728 = vmatpush3.bf16.msra.mxu1 %v1727_v20  ;;  %v785_v20 = vld [vmem:[#allocation8 + $0x360] sm:$0xff]  ;;  %v1753_v24 = vpack.c.bf16 %v772_v18, %v771_v17  ;;  %v788_v29 = vld [vmem:[#allocation8 + $0x378] sm:$0xff] }
 0x1a8   :  { %931 = vmatmul.mubr.f32.vlgmr.msra.gmra.mrb[4].mxu0 %v1825_v25  ;;  %1730 = vmatprep.subr.bf16.mxu1 %v1729_v22  ;;  %v755_v25 = vld [vmem:[#allocation8 + $0x270] sm:$0xff]  ;;  %v1776_v27 = vpack.c.bf16 %v786_v21, %v785_v20  ;;  %v1779_v31 = vpack.c.bf16 %v788_v29, %v787_v28 }
 0x1a9   :  { %1759 = vmatpush3.bf16.msra.mxu0 %v1758_v26  ;;  %1399 = vmatprep.mubr.msk.f32.mxu0 %vm2034_vm0, %v2035_v39  ;;  %v756_v26 = vld [vmem:[#allocation8 + $0x278] sm:$0xff] }
 0x1aa   :  { %1760 = vmatprep.subr.bf16.mxu0 %v2033_v56  ;;  %v1755_v30 = vpack.c.bf16 %v756_v26, %v755_v25 }
 0x1ab   :  { %1732 = vmatpush3.bf16.msra.mxu1 %v1731_v32 }
 0x1ac   :  { %1734 = vmatprep.subr.bf16.mxu1 %v1733_v33  ;;  %v359_v33 = vsub.s32 4, %v2176_v58  ;;  %v1079_v58 = vld [vmem:[#allocation11 + $0x10] sm:$0xff] }
 0x1ad   :  { %1762 = vmatpush3.bf16.msra.mxu0 %v1761_v36  ;;  %v364_v36 = vrot.slane %v2179_v60, %v363_v34 }
 0x1ae   :  { %1763 = vmatprep.subr.bf16.mxu0 %v2033_v56  ;;  %v360_v35 = vrot.slane %v2179_v60, %v359_v33  ;;  %v1785_v60 = vpack.c.bf16 %v1080_v47, %v1079_v58 }
 0x1af   :  { %1736 = vmatpush3.bf16.msra.mxu1 %v1735_v42 }
 0x1b0   :  { %1738 = vmatprep.subr.bf16.mxu1 %v1737_v43 }
 0x1b1   :  { %1765 = vmatpush3.bf16.msra.mxu0 %v1764_v46  ;;  %v1782_v46 = vpack.c.bf16 %v1078_v45, %v1077_v44 }
 0x1b2   :  { %1766 = vmatprep.subr.bf16.mxu0 %v2033_v56 }
 0x1b3   :  { %1740 = vmatpush3.bf16.msra.mxu1 %v1739_v51  ;;  %v1083_v51 = vld [vmem:[#allocation11 + $0x30] sm:$0xff] }
 0x1b4   :  { %1742 = vmatprep.subr.bf16.mxu1 %v1741_v52 }
 0x1b5   :  { %1768 = vmatpush3.bf16.msra.mxu0 %v1767_v19  ;;  %v1794_v19 = vpack.c.bf16 %v1086_v54, %v1085_v53 }
 0x1b6   :  { %1769 = vmatprep.subr.bf16.mxu0 %v2033_v56 }
 0x1b7   :  { %1744 = vmatpush3.bf16.msra.mxu1 %v1743_v62  ;;  %v1090_v62 = vld [vmem:[#allocation11 + $0x68] sm:$0xff] }
 0x1b8   :  { %v1225_v7 = vpop.f32.mrb[2].mxu1  ;;  %1746 = vmatprep.subr.bf16.mxu1 %v1745_v0  ;;  %v1800_v63 = vpack.c.bf16 %v1090_v62, %v1089_v61  ;;  %v1091_v0 = vld [vmem:[#allocation11 + $0x70] sm:$0xff] }
 0x1b9   :  { %v1226_v10 = vpop.f32.mrb[3].mxu1  ;;  %1771 = vmatpush3.bf16.msra.mxu0 %v1770_v3  ;;  %v1803_v2 = vpack.c.bf16 %v1092_v1, %v1091_v0 }
 0x1ba   :  { %v1227_v14 = vadd.f32 %v1226_v10, %v1225_v7  ;;  %1772 = vmatprep.subr.bf16.mxu0 %v2033_v56 }
 0x1bb   :  { %1748 = vmatpush3.bf16.msra.mxu1 %v1747_v9 }
 0x1bc   :  { %v667_v22 = vadd.f32 %v1227_v14, %v368_v8  ;;  %1750 = vmatprep.subr.bf16.mxu1 %v1749_v11 }
 0x1bd   :  { %1774 = vmatpush3.bf16.msra.mxu0 %v1773_v15 }
 0x1be   :  { %1828 = vtanh.f32 %v667_v22  ;;  %1775 = vmatprep.subr.bf16.mxu0 %v2033_v56 }
 0x1bf   :  { %1752 = vmatpush3.bf16.msra.mxu1 %v1751_v23 }
 0x1c0   :  { %1754 = vmatprep.subr.bf16.mxu1 %v1753_v24 }
 0x1c1   :  { %1777 = vmatpush3.bf16.msra.mxu0 %v1776_v27 }
 0x1c2   :  { %1778 = vmatprep.subr.bf16.mxu0 %v2033_v56 }
 0x1c3   :  { %1756 = vmatpush3.bf16.msra.mxu1 %v1755_v30 }
 0x1c4   :  { %1781 = vmatprep.subr.bf16.mxu1 %v2033_v56 }
 0x1c5   :  { %1780 = vmatpush3.bf16.msra.mxu0 %v1779_v31 }
 0x1c8   :  { %v1829_v32 = vpop.eup %1828 }
 0x1c9   :  { %1400 = vmatmul.mubr.f32.vlgmr.msra.gmra.mrb[6].mxu0 %v1829_v32 }
 0x1d6   :  { %v595_v37 = vpop.f32.mrb[2].mxu0 }
 0x1d7   :  { %v596_v38 = vadd.f32 %v595_v37, %v360_v35  ;;  %v597_v40 = vpop.f32.mrb[3].mxu0 }
 0x1d8   :  { %v598_v41 = vadd.f32 %v597_v40, %v364_v36 }
 0x1da   :  { %1830 = vtanh.f32 %v598_v41 }
 0x1db   :  { %1832 = vtanh.f32 %v596_v38 }
 0x1e4   :  { %v1831_v42 = vpop.eup %1830 }
 0x1e5   :  { %v1833_v43 = vpop.eup %1832  ;;  %1000 = vmatprep.mubr.f32.mxu1 %v1831_v42 }
 0x1e6   :  { %1001 = vmatmul.mubr.f32.vlgmr.msra.gmra.mrb[6].mxu1 %v1833_v43 }
 0x1e7   :  { %1434 = vmatprep.mubr.msk.f32.mxu1 %vm2034_vm0, %v2035_v39  ;;  %1783 = vmatpush3.bf16.msra.mxu1 %v1782_v46  ;;  %v1084_v39 = vld [vmem:[#allocation11 + $0x38] sm:$0xff] }
 0x1e8   :  { %1784 = vmatprep.subr.bf16.mxu1 %v2033_v56  ;;  %v1791_v52 = vpack.c.bf16 %v1084_v39, %v1083_v51 }
 0x1eb   :  { %1786 = vmatpush3.bf16.msra.mxu1 %v1785_v60 }
 0x1ec   :  { %1787 = vmatprep.subr.bf16.mxu1 %v2033_v56 }
 0x1ef   :  { %1789 = vmatpush3.bf16.msra.mxu1 %v1788_v50 }
 0x1f0   :  { %1790 = vmatprep.subr.bf16.mxu1 %v2033_v56 }
 0x1f3   :  { %1792 = vmatpush3.bf16.msra.mxu1 %v1791_v52 }
 0x1f4   :  { %1793 = vmatprep.subr.bf16.mxu1 %v2033_v56 }
 0x1f7   :  { %1795 = vmatpush3.bf16.msra.mxu1 %v1794_v19 }
 0x1f8   :  { %1796 = vmatprep.subr.bf16.mxu1 %v2033_v56 }
 0x1fb   :  { %1798 = vmatpush3.bf16.msra.mxu1 %v1797_v59 }
 0x1fc   :  { %1799 = vmatprep.subr.bf16.mxu1 %v2033_v56 }
 0x1ff   :  { %1801 = vmatpush3.bf16.msra.mxu1 %v1800_v63 }
 0x200   :  { %1802 = vmatprep.subr.bf16.mxu1 %v2033_v56  ;;  %v1192_v56 = vld [vmem:[#allocation13] ss:$0 sm:$0xff] }
 0x203   :  { %1804 = vmatpush3.bf16.msra.mxu1 %v1803_v2 }
 0x279   :  { %v1260_v3 = vpop.f32.mrb[4].mxu1 }
 0x27a   :  { %v1261_v5 = vpop.f32.mrb[5].mxu1 }
 0x27b   :  { %v1262_v16 = vadd.f32 %v1261_v5, %v1260_v3  ;;  %v1295_v6 = vpop.f32.mrb[4].mxu0 }
 0x27c   :  { %v1296_v7 = vpop.f32.mrb[5].mxu0 }
 0x27d   :  { %v863_v8 = vadd.f32 %v1262_v16, %v1191_v4  ;;  %v1297_v9 = vadd.f32 %v1296_v7, %v1295_v6 }
 0x27f   :  { %v933_v10 = vadd.f32 %v1297_v9, %v863_v8 }
 0x29c   :  { %v1072_v11 = vpop.f32.mrb[6].mxu0 }
 0x29d   :  { %v1401_v12 = vpop.f32.mrb[7].mxu0 }
 0x2b9   :  { %v1330_v13 = vpop.f32.mrb[6].mxu1 }
 0x2ba   :  { %v1331_v14 = vpop.f32.mrb[7].mxu1 }
 0x2bb   :  { %v1332_v15 = vadd.f32 %v1331_v14, %v1330_v13 }
 0x2bd   :  { %v1003_v17 = vadd.f32 %v1332_v15, %v933_v10 }
 0x2bf   :  { %v1073_v18 = vadd.f32 %v1072_v11, %v1003_v17 }
 0x2c1   :  { %1834 = vtanh.f32 %v1073_v18 }
 0x2cb   :  { %v1835_v20 = vpop.eup %1834 }
 0x2cc   :  { %1435 = vmatmul.mubr.f32.vlgmr.msra.gmra.mrb[8].mxu1 %v1835_v20 }
 0x39f   :  { %v1166_v21 = vpop.f32.mrb[8].mxu1 }
 0x3a0   :  { %v1167_v22 = vadd.f32 %v1192_v56, %v1166_v21  ;;  %v1436_v23 = vpop.f32.mrb[9].mxu1 }
 0x3a2   :  { %1171 = vst.msk [vmem:[#allocation14] sm:$0x3] %vm1170_vm1, %v1167_v22 }
 0x3a3   :  { %2001 = shalt.err (!%p1998_p4)
}
 0x3a4   :  { %s2002_s3 = scalar_lea.hbm %s2232_s7, 32 }
 0x3a5   :  { %p2003_p5 = scmp.ne.s32.totalorder %s2232_s7, %s2002_s3  ;;  %p2006_p6 = scmp.lt.u32.totalorder %s2002_s3, %s2232_s7 }
 0x3a7   :  { %p2008_p7 = pnand %p2006_p6, %p2003_p5 }
 0x3a9   :  { %2011 = shalt.err (!%p2008_p7)
}
 0x3aa   :  { %1181 = dma.vmem_to_hbm [thread:$0]  %s1179_s14, 32, %s2232_s7, [#allocation4]  }
 0x3ab   :  { %2020 = dma.done.wait [#allocation4], 32  }
 0x3ac   :  { %2021 = vsyncadd [#allocation4], 4294967264 }
 0x3ad   :  { %1185 = vsyncpa [#allocation3], 1 }
 0x3ae   :  { %1186 = vsyncpa [#allocation6], 1 }
 0x3af   :  { %1187 = vsyncpa [#allocation9], 1 }
 0x3b0   :  { %1188 = vsyncpa [#allocation12], 1 }
 0x3b1   :  { %1189 = vsyncpa [#allocation4], 1 }

</bundles_post_ra>
